<compile_context>
chip_gen: v7x
topology: tpu7x:2x2x1
jax: 0.10.0
libtpu: 0.0.40
codegen_flags: <defaults>
</compile_context>

<pallas_src>
import functools
import math

import jax
import jax.numpy as jnp
from jax import lax
from jax.experimental import pallas as pl
from jax.experimental.pallas import tpu as pltpu

_COMPUTE_DTYPE = jnp.bfloat16   # MXU operand dtype; accumulation is always f32
_LN_EPS = 1e-6


# ------------------------------ helpers -------------------------------------

def _round_up(x, m):
    return ((x + m - 1) // m) * m


def _row_tile(m, preferred=256):
    """Row tile (sublane multiple of 8); rows are zero-padded up to it."""
    return min(preferred, _round_up(m, 8))


def _col_tile(n, preferred=512):
    """Lane tile: a multiple of 128 that divides n, else the full width."""
    if n <= preferred:
        return n
    for t in (512, 384, 256, 128):
        if t <= preferred and n % t == 0:
            return t
    return n


def _seq_tile(s, preferred=256):
    if s <= preferred:
        return s
    t = preferred
    while t >= 8:
        if s % t == 0:
            return t
        t //= 2
    return s  # TODO(synk): pad the query length instead of falling back to full S.


def _pad_rows(x2d, tm):
    m = x2d.shape[0]
    mp = _round_up(m, tm)
    if mp != m:
        x2d = jnp.pad(x2d, ((0, mp - m), (0, 0)))
    return x2d, mp


@functools.lru_cache(maxsize=None)
def _vmem_limit_bytes():
    # ~75% of chip VMEM (v5e/v6e: 128 MiB, v7x: 64 MiB), conservatively capped.
    try:
        cap = int(pltpu.get_tpu_info().vmem_capacity_bytes)
    except Exception:
        cap = 64 * 1024 * 1024
    return min(int(cap * 0.75), 96 * 1024 * 1024)


def _compiler_params(dimension_semantics):
    return pltpu.CompilerParams(dimension_semantics=dimension_semantics,
                                vmem_limit_bytes=_vmem_limit_bytes())


def _const_spec(block_shape, index_map):
    """Spec for a block whose index never changes: single-buffered (halves its VMEM
    footprint since it is revisited, never re-fetched). Falls back cleanly if this
    jax version's BlockSpec has no pipeline_mode."""
    try:
        return pl.BlockSpec(block_shape, index_map, pipeline_mode=pl.Buffered(1))
    except TypeError:
        return pl.BlockSpec(block_shape, index_map)


def _layer_norm(z, gamma, beta, eps):
    mean = jnp.mean(z, axis=-1, keepdims=True)
    var = jnp.mean((z - mean) ** 2, axis=-1, keepdims=True)
    return (z - mean) * lax.rsqrt(var + eps) * gamma + beta


# ----------------------------- Pallas kernels ------------------------------

def _linear_kernel(x_ref, w_ref, b_ref, o_ref):
    # y = x @ W + b  (row tile of x, (K, tn) column slab of W; bf16 MXU, f32 acc)
    x = x_ref[...].astype(_COMPUTE_DTYPE)
    y = jnp.dot(x, w_ref[...], preferred_element_type=jnp.float32)
    o_ref[...] = (y + b_ref[...]).astype(o_ref.dtype)


def _proj_add_ln_kernel(x_ref, w_ref, b_ref, res_ref, g_ref, beta_ref, o_ref, *, eps):
    # out = LayerNorm(x @ Wo + bo + residual): matmul epilogue fusion, no extra HBM trip.
    x = x_ref[...].astype(_COMPUTE_DTYPE)
    y = jnp.dot(x, w_ref[...], preferred_element_type=jnp.float32) + b_ref[...]
    z = y + res_ref[...].astype(jnp.float32)
    o_ref[...] = _layer_norm(z, g_ref[...], beta_ref[...], eps).astype(o_ref.dtype)


def _ffn_add_ln_kernel(x_ref, w1_ref, b1_ref, w2_ref, b2_ref, g_ref, beta_ref,
                       o_ref, acc_ref, *, eps):
    # out = LayerNorm(relu(x @ W1 + b1) @ W2 + b2 + x), reduced over dff tiles.
    f = pl.program_id(1)

    @pl.when(f == 0)
    def _():
        acc_ref[...] = jnp.zeros_like(acc_ref)

    x = x_ref[...]
    xb = x.astype(_COMPUTE_DTYPE)
    h = jnp.dot(xb, w1_ref[...], preferred_element_type=jnp.float32) + b1_ref[...]
    h = jnp.maximum(h, 0.0).astype(_COMPUTE_DTYPE)
    acc_ref[...] += jnp.dot(h, w2_ref[...], preferred_element_type=jnp.float32)

    @pl.when(f == pl.num_programs(1) - 1)
    def _():
        z = acc_ref[...] + b2_ref[...] + x.astype(jnp.float32)
        o_ref[...] = _layer_norm(z, g_ref[...], beta_ref[...], eps).astype(o_ref.dtype)


def _mha_heads(q, k, v, o_ref, w_ref, *, num_heads, scale):
    # q: (tq, D); k, v: (Sk, D). Heads live as contiguous dh-wide lane slices, so no
    # (B,H,S,dh) transposes ever hit HBM; each head's context is stored directly into
    # its lane slice of the (tq, D) output block (no concatenate copy).
    d = q.shape[-1]
    dh = d // num_heads
    for h in range(num_heads):
        lo = h * dh
        qh = q[:, lo:lo + dh].astype(_COMPUTE_DTYPE)
        kh = k[:, lo:lo + dh].astype(_COMPUTE_DTYPE)
        vh = v[:, lo:lo + dh].astype(_COMPUTE_DTYPE)
        # q @ k.T without materializing the transpose (contract last dims).
        logits = lax.dot_general(qh, kh, (((1,), (1,)), ((), ())),
                                 preferred_element_type=jnp.float32) * scale
        logits = logits - jnp.max(logits, axis=-1, keepdims=True)
        e = jnp.exp(logits)
        # Approx reciprocal lands on the EUP slot; set approx=False for bit-tight
        # reference matching.
        p = e * pl.reciprocal(jnp.sum(e, axis=-1, keepdims=True), approx=True)
        if w_ref is not None:
            w_ref[0, h] = p.astype(w_ref.dtype)
        ctx = jnp.dot(p.astype(_COMPUTE_DTYPE), vh, preferred_element_type=jnp.float32)
        o_ref[0, :, lo:lo + dh] = ctx.astype(o_ref.dtype)


def _make_self_attn_kernel(*, num_heads, scale, tq, n_q_tiles, with_weights):
    def kernel(qkv_ref, o_ref, *w_refs):
        w_ref = w_refs[0] if with_weights else None
        d = o_ref.shape[-1]
        kv = qkv_ref[0]                                   # (S, 3D), resident across Sq tiles
        if n_q_tiles == 1:
            q_rows = kv
        else:
            row0 = pl.multiple_of(pl.program_id(1) * tq, tq)
            q_rows = qkv_ref[0, pl.ds(row0, tq), :]       # (tq, 3D)
        _mha_heads(q_rows[:, :d], kv[:, d:2 * d], kv[:, 2 * d:],
                   o_ref, w_ref, num_heads=num_heads, scale=scale)
    return kernel


def _make_cross_attn_kernel(*, num_heads, scale, with_weights):
    def kernel(q_ref, kv_ref, o_ref, *w_refs):
        w_ref = w_refs[0] if with_weights else None
        d = o_ref.shape[-1]
        kv = kv_ref[0]                                    # (Sk, 2D), resident across Sq tiles
        _mha_heads(q_ref[0], kv[:, :d], kv[:, d:],
                   o_ref, w_ref, num_heads=num_heads, scale=scale)
    return kernel


# ------------------------------ wrappers -----------------------------------

def linear(x2d, w, b):
    m, k = x2d.shape
    n = w.shape[1]
    tm = _row_tile(m)
    tn = _col_tile(n)
    xp, mp = _pad_rows(x2d, tm)
    itemsize = jnp.dtype(x2d.dtype).itemsize
    out = pl.pallas_call(
        _linear_kernel,
        out_shape=jax.ShapeDtypeStruct((mp, n), x2d.dtype),
        grid=(mp // tm, n // tn),
        in_specs=[pl.BlockSpec((tm, k), lambda i, j: (i, 0)),
                  pl.BlockSpec((k, tn), lambda i, j: (0, j)),
                  pl.BlockSpec((1, tn), lambda i, j: (0, j))],
        out_specs=pl.BlockSpec((tm, tn), lambda i, j: (i, j)),
        compiler_params=_compiler_params(("parallel", "parallel")),
        cost_estimate=pl.CostEstimate(
            flops=2 * m * k * n, transcendentals=0,
            bytes_accessed=itemsize * (m * k + m * n) + 2 * k * n + 4 * n),
    )(xp, w.astype(_COMPUTE_DTYPE), b.reshape(1, n).astype(jnp.float32))
    return out[:m] if mp != m else out


def proj_add_ln(x2d, w, b, res2d, gamma, beta, eps=_LN_EPS):
    m, k = x2d.shape
    n = w.shape[1]
    tm = _row_tile(m)
    xp, mp = _pad_rows(x2d, tm)
    rp, _ = _pad_rows(res2d, tm)
    itemsize = jnp.dtype(x2d.dtype).itemsize
    kern = functools.partial(_proj_add_ln_kernel, eps=eps)
    out = pl.pallas_call(
        kern,
        out_shape=jax.ShapeDtypeStruct((mp, n), x2d.dtype),
        grid=(mp // tm,),
        in_specs=[pl.BlockSpec((tm, k), lambda i: (i, 0)),
                  _const_spec((k, n), lambda i: (0, 0)),
                  _const_spec((1, n), lambda i: (0, 0)),
                  pl.BlockSpec((tm, n), lambda i: (i, 0)),
                  _const_spec((1, n), lambda i: (0, 0)),
                  _const_spec((1, n), lambda i: (0, 0))],
        out_specs=pl.BlockSpec((tm, n), lambda i: (i, 0)),
        compiler_params=_compiler_params(("parallel",)),
        cost_estimate=pl.CostEstimate(
            flops=2 * m * k * n + 10 * m * n, transcendentals=m,
            bytes_accessed=itemsize * (2 * m * k + m * n) + 2 * k * n + 12 * n),
    )(xp, w.astype(_COMPUTE_DTYPE), b.reshape(1, n).astype(jnp.float32),
      rp, gamma.reshape(1, n), beta.reshape(1, n))
    return out[:m] if mp != m else out


def ffn_add_ln(x2d, w1, b1, w2, b2, gamma, beta, eps=_LN_EPS):
    m, d = x2d.shape
    dff = w1.shape[1]
    tm = _row_tile(m)
    tf = _col_tile(dff)
    xp, mp = _pad_rows(x2d, tm)
    itemsize = jnp.dtype(x2d.dtype).itemsize
    kern = functools.partial(_ffn_add_ln_kernel, eps=eps)
    out = pl.pallas_call(
        kern,
        out_shape=jax.ShapeDtypeStruct((mp, d), x2d.dtype),
        grid=(mp // tm, dff // tf),
        in_specs=[pl.BlockSpec((tm, d), lambda i, j: (i, 0)),
                  pl.BlockSpec((d, tf), lambda i, j: (0, j)),
                  pl.BlockSpec((1, tf), lambda i, j: (0, j)),
                  pl.BlockSpec((tf, d), lambda i, j: (j, 0)),
                  _const_spec((1, d), lambda i, j: (0, 0)),
                  _const_spec((1, d), lambda i, j: (0, 0)),
                  _const_spec((1, d), lambda i, j: (0, 0))],
        out_specs=pl.BlockSpec((tm, d), lambda i, j: (i, 0)),
        scratch_shapes=[pltpu.VMEM((tm, d), jnp.float32)],
        compiler_params=_compiler_params(("parallel", "arbitrary")),
        cost_estimate=pl.CostEstimate(
            flops=4 * m * d * dff + 10 * m * d, transcendentals=m,
            bytes_accessed=itemsize * (2 * m * d) + 4 * d * dff + 2 * dff + 12 * d),
    )(xp, w1.astype(_COMPUTE_DTYPE), b1.reshape(1, dff).astype(jnp.float32),
      w2.astype(_COMPUTE_DTYPE), b2.reshape(1, d).astype(jnp.float32),
      gamma.reshape(1, d), beta.reshape(1, d))
    return out[:m] if mp != m else out


def self_attention(qkv, num_heads, *, return_weights=True):
    # qkv: (B, S, 3D) with Q | K | V along the last dim (sliced in-kernel).
    b, s, d3 = qkv.shape
    d = d3 // 3
    dh = d // num_heads
    tq = _seq_tile(s)
    nq = s // tq
    kern = _make_self_attn_kernel(num_heads=num_heads, scale=1.0 / math.sqrt(dh),
                                  tq=tq, n_q_tiles=nq, with_weights=return_weights)
    out_shape = [jax.ShapeDtypeStruct((b, s, d), qkv.dtype)]
    out_specs = [pl.BlockSpec((1, tq, d), lambda bi, si: (bi, si, 0))]
    if return_weights:
        out_shape.append(jax.ShapeDtypeStruct((b, num_heads, s, s), jnp.float32))
        out_specs.append(pl.BlockSpec((1, num_heads, tq, s),
                                      lambda bi, si: (bi, 0, si, 0)))
    itemsize = jnp.dtype(qkv.dtype).itemsize
    res = pl.pallas_call(
        kern,
        out_shape=tuple(out_shape),
        grid=(b, nq),
        in_specs=[pl.BlockSpec((1, s, d3), lambda bi, si: (bi, 0, 0))],  # resident per batch
        out_specs=tuple(out_specs),
        compiler_params=_compiler_params(("parallel", "parallel")),
        cost_estimate=pl.CostEstimate(
            flops=4 * b * num_heads * s * s * dh,
            transcendentals=b * num_heads * s * s,
            bytes_accessed=itemsize * (b * s * d3 + b * s * d)
                           + (4 * b * num_heads * s * s if return_weights else 0)),
    )(qkv)
    return res[0], (res[1] if return_weights else None)


def cross_attention(q, kv, num_heads, *, return_weights=True):
    # q: (B, Sq, D); kv: (B, Sk, 2D) with K | V along the last dim.
    b, sq, d = q.shape
    sk = kv.shape[1]
    dh = d // num_heads
    tq = _seq_tile(sq)
    nq = sq // tq
    kern = _make_cross_attn_kernel(num_heads=num_heads, scale=1.0 / math.sqrt(dh),
                                   with_weights=return_weights)
    out_shape = [jax.ShapeDtypeStruct((b, sq, d), q.dtype)]
    out_specs = [pl.BlockSpec((1, tq, d), lambda bi, si: (bi, si, 0))]
    if return_weights:
        out_shape.append(jax.ShapeDtypeStruct((b, num_heads, sq, sk), jnp.float32))
        out_specs.append(pl.BlockSpec((1, num_heads, tq, sk),
                                      lambda bi, si: (bi, 0, si, 0)))
    itemsize = jnp.dtype(q.dtype).itemsize
    res = pl.pallas_call(
        kern,
        out_shape=tuple(out_shape),
        grid=(b, nq),
        in_specs=[pl.BlockSpec((1, tq, d), lambda bi, si: (bi, si, 0)),
                  pl.BlockSpec((1, sk, 2 * d), lambda bi, si: (bi, 0, 0))],  # resident per batch
        out_specs=tuple(out_specs),
        compiler_params=_compiler_params(("parallel", "parallel")),
        cost_estimate=pl.CostEstimate(
            flops=4 * b * num_heads * sq * sk * dh,
            transcendentals=b * num_heads * sq * sk,
            bytes_accessed=itemsize * (b * sq * d + b * sk * 2 * d + b * sq * d)
                           + (4 * b * num_heads * sq * sk if return_weights else 0)),
    )(q, kv)
    return res[0], (res[1] if return_weights else None)


# ------------------------------ forward -------------------------------------

@functools.partial(jax.jit, static_argnames=("num_heads",))
def decoder_layer_forward(params, x, enc_output, *, num_heads):
    B, S, D = x.shape
    Se = enc_output.shape[1]
    x2d = x.reshape(B * S, D)
    enc2d = enc_output.reshape(B * Se, D)

    # ---- Block 1: masked self-attention (mask is None) + residual + LN ----
    m1 = params["mha1"]
    qkv = linear(x2d, m1["w_qkv"], m1["b_qkv"]).reshape(B, S, 3 * D)   # fused Q|K|V proj
    ctx1, attn_w1 = self_attention(qkv, num_heads)
    out1_2d = proj_add_ln(ctx1.reshape(B * S, D), m1["wo"], m1["bo"],
                          x2d, params["ln1_g"], params["ln1_b"])

    # ---- Block 2: cross-attention (q = out1, k/v = enc_output) + residual + LN ----
    m2 = params["mha2"]
    q2 = linear(out1_2d, m2["wq"], m2["bq"]).reshape(B, S, D)
    kv2 = linear(enc2d, m2["w_kv"], m2["b_kv"]).reshape(B, Se, 2 * D)  # fused K|V proj
    ctx2, attn_w2 = cross_attention(q2, kv2, num_heads)
    out2_2d = proj_add_ln(ctx2.reshape(B * S, D), m2["wo"], m2["bo"],
                          out1_2d, params["ln2_g"], params["ln2_b"])

    # ---- Block 3: pointwise FFN + residual + LN (single fused kernel, dff-tiled) ----
    out3_2d = ffn_add_ln(out2_2d, params["ffn_w1"], params["ffn_b1"],
                         params["ffn_w2"], params["ffn_b2"],
                         params["ln3_g"], params["ln3_b"])

    return out3_2d.reshape(B, S, D), attn_w1, attn_w2


# ------------------------------ parameters ----------------------------------

def init_params(key, d_model, num_heads, dff):
    D = d_model

    def dense(k, n_in, n_out):
        return jax.random.normal(k, (n_in, n_out), jnp.float32) / (n_in ** 0.5)

    ks = jax.random.split(key, 10)
    mha1 = {
        "w_qkv": jnp.concatenate([dense(ks[0], D, D), dense(ks[1], D, D),
                                  dense(ks[2], D, D)], axis=1),   # (D, 3D)
        "b_qkv": jnp.zeros((3 * D,), jnp.float32),
        "wo": dense(ks[3], D, D), "bo": jnp.zeros((D,), jnp.float32),
    }
    mha2 = {
        "wq": dense(ks[4], D, D), "bq": jnp.zeros((D,), jnp.float32),
        "w_kv": jnp.concatenate([dense(ks[5], D, D), dense(ks[6], D, D)], axis=1),  # (D, 2D)
        "b_kv": jnp.zeros((2 * D,), jnp.float32),
        "wo": dense(ks[7], D, D), "bo": jnp.zeros((D,), jnp.float32),
    }
    return {
        "mha1": mha1,
        "mha2": mha2,
        "ffn_w1": dense(ks[8], D, dff), "ffn_b1": jnp.zeros((dff,), jnp.float32),
        "ffn_w2": dense(ks[9], dff, D), "ffn_b2": jnp.zeros((D,), jnp.float32),
        "ln1_g": jnp.ones((D,), jnp.float32), "ln1_b": jnp.zeros((D,), jnp.float32),
        "ln2_g": jnp.ones((D,), jnp.float32), "ln2_b": jnp.zeros((D,), jnp.float32),
        "ln3_g": jnp.ones((D,), jnp.float32), "ln3_b": jnp.zeros((D,), jnp.float32),
    }


# --------------------------------- main --------------------------------------

if __name__ == "__main__":
    B, S, S_ENC, D_MODEL, NUM_HEADS, DFF = 2, 8, 8, 32, 4, 64

    key = jax.random.PRNGKey(0)
    kp, kx, ke = jax.random.split(key, 3)
    params = init_params(kp, D_MODEL, NUM_HEADS, DFF)
    x = jax.random.normal(kx, (B, S, D_MODEL), jnp.float32)
    enc_output = jax.random.normal(ke, (B, S_ENC, D_MODEL), jnp.float32)

    out3, attn_w1, attn_w2 = decoder_layer_forward(params, x, enc_output,
                                                   num_heads=NUM_HEADS)
    jax.block_until_ready((out3, attn_w1, attn_w2))

    assert out3.shape == (B, S, D_MODEL)
    assert attn_w1.shape == (B, NUM_HEADS, S, S)
    assert attn_w2.shape == (B, NUM_HEADS, S, S_ENC)
    assert bool(jnp.all(jnp.isfinite(out3)))
    assert bool(jnp.all(jnp.isfinite(attn_w1))) and bool(jnp.all(jnp.isfinite(attn_w2)))
    print("KERNEL_OK")
</pallas_src>

<mosaic_0001>
module attributes {stable_mosaic.version = 11 : i64} {
  func.func @_linear_kernel(%arg0: i32, %arg1: i32, %arg2: memref<16x32xf32, #tpu.memory_space<vmem>>, %arg3: memref<32x96xbf16, #tpu.memory_space<vmem>>, %arg4: memref<1x96xf32, #tpu.memory_space<vmem>>, %arg5: memref<16x96xf32, #tpu.memory_space<vmem>>) attributes {dimension_semantics = [#tpu.dimension_semantics<parallel>, #tpu.dimension_semantics<parallel>], iteration_bounds = array<i64: 1, 1>, scalar_prefetch = 0 : i64, scratch_operands = 0 : i64, tpu.core_type = #tpu.core_type<tc>, window_params = [{transform_indices = @transform_0, window_bounds = array<i64: 16, 32>}, {transform_indices = @transform_1, window_bounds = array<i64: 32, 96>}, {transform_indices = @transform_2, window_bounds = array<i64: 1, 96>}, {transform_indices = @transform_3, window_bounds = array<i64: 16, 96>}]} {
    %c0 = arith.constant 0 : index
    %c0_0 = arith.constant 0 : index
    %0 = vector.load %arg2[%c0, %c0_0] : memref<16x32xf32, #tpu.memory_space<vmem>>, vector<16x32xf32>
    %1 = arith.truncf %0 : vector<16x32xf32> to vector<16x32xbf16>
    %c0_1 = arith.constant 0 : index
    %c0_2 = arith.constant 0 : index
    %2 = vector.load %arg3[%c0_1, %c0_2] : memref<32x96xbf16, #tpu.memory_space<vmem>>, vector<32x96xbf16>
    %cst = arith.constant dense<0.000000e+00> : vector<16x96xf32>
    %3 = tpu.matmul %1, %2, %cst {dimension_numbers = #tpu.dot_dimension_numbers<[1], [0], [0], [1], [0, 0, 1, 1], [], []>} : vector<16x32xbf16>, vector<32x96xbf16>, vector<16x96xf32> -> vector<16x96xf32>
    %c0_3 = arith.constant 0 : index
    %c0_4 = arith.constant 0 : index
    %4 = vector.load %arg4[%c0_3, %c0_4] : memref<1x96xf32, #tpu.memory_space<vmem>>, vector<1x96xf32>
    %5 = vector.broadcast %4 : vector<1x96xf32> to vector<16x96xf32>
    %6 = arith.addf %3, %5 : vector<16x96xf32>
    %c0_5 = arith.constant 0 : index
    %c0_6 = arith.constant 0 : index
    %7 = vector.load %arg5[%c0_5, %c0_6] : memref<16x96xf32, #tpu.memory_space<vmem>>, vector<16x96xf32>
    tpu.vector_store %arg5[%c0_5, %c0_6], %6 {strides = array<i32>} : memref<16x96xf32, #tpu.memory_space<vmem>>, vector<16x96xf32>,
    return
  }
  func.func @transform_0(%arg0: i32, %arg1: i32) -> (i32, i32) {
    %c0_i32 = arith.constant 0 : i32
    %c0_i32_0 = arith.constant 0 : i32
    return %arg0, %c0_i32 : i32, i32
  }
  func.func @transform_1(%arg0: i32, %arg1: i32) -> (i32, i32) {
    %c0_i32 = arith.constant 0 : i32
    %c0_i32_0 = arith.constant 0 : i32
    return %c0_i32, %arg1 : i32, i32
  }
  func.func @transform_2(%arg0: i32, %arg1: i32) -> (i32, i32) {
    %c0_i32 = arith.constant 0 : i32
    %c0_i32_0 = arith.constant 0 : i32
    return %c0_i32, %arg1 : i32, i32
  }
  func.func @transform_3(%arg0: i32, %arg1: i32) -> (i32, i32) {
    %c0_i32 = arith.constant 0 : i32
    return %arg0, %arg1 : i32, i32
  }
}

module attributes {stable_mosaic.version = 11 : i64} {
  func.func @kernel(%arg0: i32, %arg1: i32, %arg2: memref<1x8x96xf32, #tpu.memory_space<vmem>>, %arg3: memref<1x8x32xf32, #tpu.memory_space<vmem>>, %arg4: memref<1x4x8x8xf32, #tpu.memory_space<vmem>>) attributes {dimension_semantics = [#tpu.dimension_semantics<parallel>, #tpu.dimension_semantics<parallel>], iteration_bounds = array<i64: 2, 1>, scalar_prefetch = 0 : i64, scratch_operands = 0 : i64, tpu.core_type = #tpu.core_type<tc>, window_params = [{transform_indices = @transform_0, window_bounds = array<i64: 1, 8, 96>}, {transform_indices = @transform_1, window_bounds = array<i64: 1, 8, 32>}, {transform_indices = @transform_2, window_bounds = array<i64: 1, 4, 8, 8>}]} {
    %c0 = arith.constant 0 : index
    %c0_0 = arith.constant 0 : index
    %c0_1 = arith.constant 0 : index
    %0 = vector.load %arg2[%c0, %c0_0, %c0_1] : memref<1x8x96xf32, #tpu.memory_space<vmem>>, vector<1x8x96xf32>
    %1 = vector.shape_cast %0 : vector<1x8x96xf32> to vector<8x96xf32>
    %2 = vector.extract_strided_slice %1 {offsets = [0, 0], sizes = [8, 32], strides = [1, 1]} : vector<8x96xf32> to vector<8x32xf32>
    %3 = vector.extract_strided_slice %1 {offsets = [0, 32], sizes = [8, 32], strides = [1, 1]} : vector<8x96xf32> to vector<8x32xf32>
    %4 = vector.extract_strided_slice %1 {offsets = [0, 64], sizes = [8, 32], strides = [1, 1]} : vector<8x96xf32> to vector<8x32xf32>
    %5 = vector.extract_strided_slice %2 {offsets = [0, 0], sizes = [8, 8], strides = [1, 1]} : vector<8x32xf32> to vector<8x8xf32>
    %6 = arith.truncf %5 : vector<8x8xf32> to vector<8x8xbf16>
    %7 = vector.extract_strided_slice %3 {offsets = [0, 0], sizes = [8, 8], strides = [1, 1]} : vector<8x32xf32> to vector<8x8xf32>
    %8 = arith.truncf %7 : vector<8x8xf32> to vector<8x8xbf16>
    %9 = vector.extract_strided_slice %4 {offsets = [0, 0], sizes = [8, 8], strides = [1, 1]} : vector<8x32xf32> to vector<8x8xf32>
    %10 = arith.truncf %9 : vector<8x8xf32> to vector<8x8xbf16>
    %cst = arith.constant dense<0.000000e+00> : vector<8x8xf32>
    %11 = tpu.matmul %6, %8, %cst {dimension_numbers = #tpu.dot_dimension_numbers<[1], [1], [0], [0], [0, 0, 1, 0], [], []>} : vector<8x8xbf16>, vector<8x8xbf16>, vector<8x8xf32> -> vector<8x8xf32>
    %cst_2 = arith.constant 0.353553385 : f32
    %12 = vector.broadcast %cst_2 : f32 to vector<8x8xf32>
    %13 = arith.mulf %11, %12 : vector<8x8xf32>
    %cst_3 = arith.constant dense<0xFF800000> : vector<8xf32>
    %14 = vector.multi_reduction <maximumf>, %13, %cst_3 [1] : vector<8x8xf32> to vector<8xf32>
    %15 = vector.shape_cast %14 : vector<8xf32> to vector<8x1xf32>
    %16 = vector.broadcast %15 : vector<8x1xf32> to vector<8x8xf32>
    %17 = arith.subf %13, %16 : vector<8x8xf32>
    %18 = math.exp %17 : vector<8x8xf32>
    %cst_4 = arith.constant dense<0.000000e+00> : vector<8xf32>
    %19 = vector.multi_reduction <add>, %18, %cst_4 [1] : vector<8x8xf32> to vector<8xf32>
    %20 = vector.shape_cast %19 : vector<8xf32> to vector<8x1xf32>
    %21 = tpu.reciprocal %20 {approx = true} : vector<8x1xf32> -> vector<8x1xf32>
    %22 = vector.broadcast %21 : vector<8x1xf32> to vector<8x8xf32>
    %23 = arith.mulf %18, %22 : vector<8x8xf32>
    %c0_5 = arith.constant 0 : index
    %c0_6 = arith.constant 0 : index
    %c0_7 = arith.constant 0 : index
    %c0_8 = arith.constant 0 : index
    %24 = vector.load %arg4[%c0_5, %c0_6, %c0_7, %c0_8] : memref<1x4x8x8xf32, #tpu.memory_space<vmem>>, vector<1x1x8x8xf32>
    %25 = vector.shape_cast %24 : vector<1x1x8x8xf32> to vector<8x8xf32>
    %26 = vector.shape_cast %23 : vector<8x8xf32> to vector<1x1x8x8xf32>
    tpu.vector_store %arg4[%c0_5, %c0_6, %c0_7, %c0_8], %26 {strides = array<i32>} : memref<1x4x8x8xf32, #tpu.memory_space<vmem>>, vector<1x1x8x8xf32>,
    %27 = arith.truncf %23 : vector<8x8xf32> to vector<8x8xbf16>
    %cst_9 = arith.constant dense<0.000000e+00> : vector<8x8xf32>
    %28 = tpu.matmul %27, %10, %cst_9 {dimension_numbers = #tpu.dot_dimension_numbers<[1], [0], [0], [1], [0, 0, 1, 1], [], []>} : vector<8x8xbf16>, vector<8x8xbf16>, vector<8x8xf32> -> vector<8x8xf32>
    %c0_10 = arith.constant 0 : index
    %c0_11 = arith.constant 0 : index
    %c0_12 = arith.constant 0 : index
    %29 = vector.load %arg3[%c0_10, %c0_11, %c0_12] : memref<1x8x32xf32, #tpu.memory_space<vmem>>, vector<1x8x8xf32>
    %30 = vector.shape_cast %29 : vector<1x8x8xf32> to vector<8x8xf32>
    %31 = vector.shape_cast %28 : vector<8x8xf32> to vector<1x8x8xf32>
    tpu.vector_store %arg3[%c0_10, %c0_11, %c0_12], %31 {strides = array<i32>} : memref<1x8x32xf32, #tpu.memory_space<vmem>>, vector<1x8x8xf32>,
    %32 = vector.extract_strided_slice %2 {offsets = [0, 8], sizes = [8, 8], strides = [1, 1]} : vector<8x32xf32> to vector<8x8xf32>
    %33 = arith.truncf %32 : vector<8x8xf32> to vector<8x8xbf16>
    %34 = vector.extract_strided_slice %3 {offsets = [0, 8], sizes = [8, 8], strides = [1, 1]} : vector<8x32xf32> to vector<8x8xf32>
    %35 = arith.truncf %34 : vector<8x8xf32> to vector<8x8xbf16>
    %36 = vector.extract_strided_slice %4 {offsets = [0, 8], sizes = [8, 8], strides = [1, 1]} : vector<8x32xf32> to vector<8x8xf32>
    %37 = arith.truncf %36 : vector<8x8xf32> to vector<8x8xbf16>
    %cst_13 = arith.constant dense<0.000000e+00> : vector<8x8xf32>
    %38 = tpu.matmul %33, %35, %cst_13 {dimension_numbers = #tpu.dot_dimension_numbers<[1], [1], [0], [0], [0, 0, 1, 0], [], []>} : vector<8x8xbf16>, vector<8x8xbf16>, vector<8x8xf32> -> vector<8x8xf32>
    %cst_14 = arith.constant 0.353553385 : f32
    %39 = vector.broadcast %cst_14 : f32 to vector<8x8xf32>
    %40 = arith.mulf %38, %39 : vector<8x8xf32>
    %cst_15 = arith.constant dense<0xFF800000> : vector<8xf32>
    %41 = vector.multi_reduction <maximumf>, %40, %cst_15 [1] : vector<8x8xf32> to vector<8xf32>
    %42 = vector.shape_cast %41 : vector<8xf32> to vector<8x1xf32>
    %43 = vector.broadcast %42 : vector<8x1xf32> to vector<8x8xf32>
    %44 = arith.subf %40, %43 : vector<8x8xf32>
    %45 = math.exp %44 : vector<8x8xf32>
    %cst_16 = arith.constant dense<0.000000e+00> : vector<8xf32>
    %46 = vector.multi_reduction <add>, %45, %cst_16 [1] : vector<8x8xf32> to vector<8xf32>
    %47 = vector.shape_cast %46 : vector<8xf32> to vector<8x1xf32>
    %48 = tpu.reciprocal %47 {approx = true} : vector<8x1xf32> -> vector<8x1xf32>
    %49 = vector.broadcast %48 : vector<8x1xf32> to vector<8x8xf32>
    %50 = arith.mulf %45, %49 : vector<8x8xf32>
    %c0_17 = arith.constant 0 : index
    %c1 = arith.constant 1 : index
    %c0_18 = arith.constant 0 : index
    %c0_19 = arith.constant 0 : index
    %51 = vector.load %arg4[%c0_17, %c1, %c0_18, %c0_19] : memref<1x4x8x8xf32, #tpu.memory_space<vmem>>, vector<1x1x8x8xf32>
    %52 = vector.shape_cast %51 : vector<1x1x8x8xf32> to vector<8x8xf32>
    %53 = vector.shape_cast %50 : vector<8x8xf32> to vector<1x1x8x8xf32>
    tpu.vector_store %arg4[%c0_17, %c1, %c0_18, %c0_19], %53 {strides = array<i32>} : memref<1x4x8x8xf32, #tpu.memory_space<vmem>>, vector<1x1x8x8xf32>,
    %54 = arith.truncf %50 : vector<8x8xf32> to vector<8x8xbf16>
    %cst_20 = arith.constant dense<0.000000e+00> : vector<8x8xf32>
    %55 = tpu.matmul %54, %37, %cst_20 {dimension_numbers = #tpu.dot_dimension_numbers<[1], [0], [0], [1], [0, 0, 1, 1], [], []>} : vector<8x8xbf16>, vector<8x8xbf16>, vector<8x8xf32> -> vector<8x8xf32>
    %c0_21 = arith.constant 0 : index
    %c0_22 = arith.constant 0 : index
    %c8 = arith.constant 8 : index
    %56 = vector.load %arg3[%c0_21, %c0_22, %c8] : memref<1x8x32xf32, #tpu.memory_space<vmem>>, vector<1x8x8xf32>
    %57 = vector.shape_cast %56 : vector<1x8x8xf32> to vector<8x8xf32>
    %58 = vector.shape_cast %55 : vector<8x8xf32> to vector<1x8x8xf32>
    tpu.vector_store %arg3[%c0_21, %c0_22, %c8], %58 {strides = array<i32>} : memref<1x8x32xf32, #tpu.memory_space<vmem>>, vector<1x8x8xf32>,
    %59 = vector.extract_strided_slice %2 {offsets = [0, 16], sizes = [8, 8], strides = [1, 1]} : vector<8x32xf32> to vector<8x8xf32>
    %60 = arith.truncf %59 : vector<8x8xf32> to vector<8x8xbf16>
    %61 = vector.extract_strided_slice %3 {offsets = [0, 16], sizes = [8, 8], strides = [1, 1]} : vector<8x32xf32> to vector<8x8xf32>
    %62 = arith.truncf %61 : vector<8x8xf32> to vector<8x8xbf16>
    %63 = vector.extract_strided_slice %4 {offsets = [0, 16], sizes = [8, 8], strides = [1, 1]} : vector<8x32xf32> to vector<8x8xf32>
    %64 = arith.truncf %63 : vector<8x8xf32> to vector<8x8xbf16>
    %cst_23 = arith.constant dense<0.000000e+00> : vector<8x8xf32>
    %65 = tpu.matmul %60, %62, %cst_23 {dimension_numbers = #tpu.dot_dimension_numbers<[1], [1], [0], [0], [0, 0, 1, 0], [], []>} : vector<8x8xbf16>, vector<8x8xbf16>, vector<8x8xf32> -> vector<8x8xf32>
    %cst_24 = arith.constant 0.353553385 : f32
    %66 = vector.broadcast %cst_24 : f32 to vector<8x8xf32>
    %67 = arith.mulf %65, %66 : vector<8x8xf32>
    %cst_25 = arith.constant dense<0xFF800000> : vector<8xf32>
    %68 = vector.multi_reduction <maximumf>, %67, %cst_25 [1] : vector<8x8xf32> to vector<8xf32>
    %69 = vector.shape_cast %68 : vector<8xf32> to vector<8x1xf32>
    %70 = vector.broadcast %69 : vector<8x1xf32> to vector<8x8xf32>
    %71 = arith.subf %67, %70 : vector<8x8xf32>
    %72 = math.exp %71 : vector<8x8xf32>
    %cst_26 = arith.constant dense<0.000000e+00> : vector<8xf32>
    %73 = vector.multi_reduction <add>, %72, %cst_26 [1] : vector<8x8xf32> to vector<8xf32>
    %74 = vector.shape_cast %73 : vector<8xf32> to vector<8x1xf32>
    %75 = tpu.reciprocal %74 {approx = true} : vector<8x1xf32> -> vector<8x1xf32>
    %76 = vector.broadcast %75 : vector<8x1xf32> to vector<8x8xf32>
    %77 = arith.mulf %72, %76 : vector<8x8xf32>
    %c0_27 = arith.constant 0 : index
    %c2 = arith.constant 2 : index
    %c0_28 = arith.constant 0 : index
    %c0_29 = arith.constant 0 : index
    %78 = vector.load %arg4[%c0_27, %c2, %c0_28, %c0_29] : memref<1x4x8x8xf32, #tpu.memory_space<vmem>>, vector<1x1x8x8xf32>
    %79 = vector.shape_cast %78 : vector<1x1x8x8xf32> to vector<8x8xf32>
    %80 = vector.shape_cast %77 : vector<8x8xf32> to vector<1x1x8x8xf32>
    tpu.vector_store %arg4[%c0_27, %c2, %c0_28, %c0_29], %80 {strides = array<i32>} : memref<1x4x8x8xf32, #tpu.memory_space<vmem>>, vector<1x1x8x8xf32>,
    %81 = arith.truncf %77 : vector<8x8xf32> to vector<8x8xbf16>
    %cst_30 = arith.constant dense<0.000000e+00> : vector<8x8xf32>
    %82 = tpu.matmul %81, %64, %cst_30 {dimension_numbers = #tpu.dot_dimension_numbers<[1], [0], [0], [1], [0, 0, 1, 1], [], []>} : vector<8x8xbf16>, vector<8x8xbf16>, vector<8x8xf32> -> vector<8x8xf32>
    %c0_31 = arith.constant 0 : index
    %c0_32 = arith.constant 0 : index
    %c16 = arith.constant 16 : index
    %83 = vector.load %arg3[%c0_31, %c0_32, %c16] : memref<1x8x32xf32, #tpu.memory_space<vmem>>, vector<1x8x8xf32>
    %84 = vector.shape_cast %83 : vector<1x8x8xf32> to vector<8x8xf32>
    %85 = vector.shape_cast %82 : vector<8x8xf32> to vector<1x8x8xf32>
    tpu.vector_store %arg3[%c0_31, %c0_32, %c16], %85 {strides = array<i32>} : memref<1x8x32xf32, #tpu.memory_space<vmem>>, vector<1x8x8xf32>,
    %86 = vector.extract_strided_slice %2 {offsets = [0, 24], sizes = [8, 8], strides = [1, 1]} : vector<8x32xf32> to vector<8x8xf32>
    %87 = arith.truncf %86 : vector<8x8xf32> to vector<8x8xbf16>
    %88 = vector.extract_strided_slice %3 {offsets = [0, 24], sizes = [8, 8], strides = [1, 1]} : vector<8x32xf32> to vector<8x8xf32>
    %89 = arith.truncf %88 : vector<8x8xf32> to vector<8x8xbf16>
    %90 = vector.extract_strided_slice %4 {offsets = [0, 24], sizes = [8, 8], strides = [1, 1]} : vector<8x32xf32> to vector<8x8xf32>
    %91 = arith.truncf %90 : vector<8x8xf32> to vector<8x8xbf16>
    %cst_33 = arith.constant dense<0.000000e+00> : vector<8x8xf32>
    %92 = tpu.matmul %87, %89, %cst_33 {dimension_numbers = #tpu.dot_dimension_numbers<[1], [1], [0], [0], [0, 0, 1, 0], [], []>} : vector<8x8xbf16>, vector<8x8xbf16>, vector<8x8xf32> -> vector<8x8xf32>
    %cst_34 = arith.constant 0.353553385 : f32
    %93 = vector.broadcast %cst_34 : f32 to vector<8x8xf32>
    %94 = arith.mulf %92, %93 : vector<8x8xf32>
    %cst_35 = arith.constant dense<0xFF800000> : vector<8xf32>
    %95 = vector.multi_reduction <maximumf>, %94, %cst_35 [1] : vector<8x8xf32> to vector<8xf32>
    %96 = vector.shape_cast %95 : vector<8xf32> to vector<8x1xf32>
    %97 = vector.broadcast %96 : vector<8x1xf32> to vector<8x8xf32>
    %98 = arith.subf %94, %97 : vector<8x8xf32>
    %99 = math.exp %98 : vector<8x8xf32>
    %cst_36 = arith.constant dense<0.000000e+00> : vector<8xf32>
    %100 = vector.multi_reduction <add>, %99, %cst_36 [1] : vector<8x8xf32> to vector<8xf32>
    %101 = vector.shape_cast %100 : vector<8xf32> to vector<8x1xf32>
    %102 = tpu.reciprocal %101 {approx = true} : vector<8x1xf32> -> vector<8x1xf32>
    %103 = vector.broadcast %102 : vector<8x1xf32> to vector<8x8xf32>
    %104 = arith.mulf %99, %103 : vector<8x8xf32>
    %c0_37 = arith.constant 0 : index
    %c3 = arith.constant 3 : index
    %c0_38 = arith.constant 0 : index
    %c0_39 = arith.constant 0 : index
    %105 = vector.load %arg4[%c0_37, %c3, %c0_38, %c0_39] : memref<1x4x8x8xf32, #tpu.memory_space<vmem>>, vector<1x1x8x8xf32>
    %106 = vector.shape_cast %105 : vector<1x1x8x8xf32> to vector<8x8xf32>
    %107 = vector.shape_cast %104 : vector<8x8xf32> to vector<1x1x8x8xf32>
    tpu.vector_store %arg4[%c0_37, %c3, %c0_38, %c0_39], %107 {strides = array<i32>} : memref<1x4x8x8xf32, #tpu.memory_space<vmem>>, vector<1x1x8x8xf32>,
    %108 = arith.truncf %104 : vector<8x8xf32> to vector<8x8xbf16>
    %cst_40 = arith.constant dense<0.000000e+00> : vector<8x8xf32>
    %109 = tpu.matmul %108, %91, %cst_40 {dimension_numbers = #tpu.dot_dimension_numbers<[1], [0], [0], [1], [0, 0, 1, 1], [], []>} : vector<8x8xbf16>, vector<8x8xbf16>, vector<8x8xf32> -> vector<8x8xf32>
    %c0_41 = arith.constant 0 : index
    %c0_42 = arith.constant 0 : index
    %c24 = arith.constant 24 : index
    %110 = vector.load %arg3[%c0_41, %c0_42, %c24] : memref<1x8x32xf32, #tpu.memory_space<vmem>>, vector<1x8x8xf32>
    %111 = vector.shape_cast %110 : vector<1x8x8xf32> to vector<8x8xf32>
    %112 = vector.shape_cast %109 : vector<8x8xf32> to vector<1x8x8xf32>
    tpu.vector_store %arg3[%c0_41, %c0_42, %c24], %112 {strides = array<i32>} : memref<1x8x32xf32, #tpu.memory_space<vmem>>, vector<1x8x8xf32>,
    return
  }
  func.func @transform_0(%arg0: i32, %arg1: i32) -> (i32, i32, i32) {
    %c0_i32 = arith.constant 0 : i32
    %c0_i32_0 = arith.constant 0 : i32
    %c0_i32_1 = arith.constant 0 : i32
    return %arg0, %c0_i32, %c0_i32_0 : i32, i32, i32
  }
  func.func @transform_1(%arg0: i32, %arg1: i32) -> (i32, i32, i32) {
    %c0_i32 = arith.constant 0 : i32
    %c0_i32_0 = arith.constant 0 : i32
    return %arg0, %arg1, %c0_i32 : i32, i32, i32
  }
  func.func @transform_2(%arg0: i32, %arg1: i32) -> (i32, i32, i32, i32) {
    %c0_i32 = arith.constant 0 : i32
    %c0_i32_0 = arith.constant 0 : i32
    %c0_i32_1 = arith.constant 0 : i32
    return %arg0, %c0_i32, %arg1, %c0_i32_0 : i32, i32, i32, i32
  }
}

module attributes {stable_mosaic.version = 11 : i64} {
  func.func @_linear_kernel(%arg0: i32, %arg1: i32, %arg2: memref<16x32xf32, #tpu.memory_space<vmem>>, %arg3: memref<32x32xbf16, #tpu.memory_space<vmem>>, %arg4: memref<1x32xf32, #tpu.memory_space<vmem>>, %arg5: memref<16x32xf32, #tpu.memory_space<vmem>>) attributes {dimension_semantics = [#tpu.dimension_semantics<parallel>, #tpu.dimension_semantics<parallel>], iteration_bounds = array<i64: 1, 1>, scalar_prefetch = 0 : i64, scratch_operands = 0 : i64, tpu.core_type = #tpu.core_type<tc>, window_params = [{transform_indices = @transform_0, window_bounds = array<i64: 16, 32>}, {transform_indices = @transform_1, window_bounds = array<i64: 32, 32>}, {transform_indices = @transform_2, window_bounds = array<i64: 1, 32>}, {transform_indices = @transform_3, window_bounds = array<i64: 16, 32>}]} {
    %c0 = arith.constant 0 : index
    %c0_0 = arith.constant 0 : index
    %0 = vector.load %arg2[%c0, %c0_0] : memref<16x32xf32, #tpu.memory_space<vmem>>, vector<16x32xf32>
    %1 = arith.truncf %0 : vector<16x32xf32> to vector<16x32xbf16>
    %c0_1 = arith.constant 0 : index
    %c0_2 = arith.constant 0 : index
    %2 = vector.load %arg3[%c0_1, %c0_2] : memref<32x32xbf16, #tpu.memory_space<vmem>>, vector<32x32xbf16>
    %cst = arith.constant dense<0.000000e+00> : vector<16x32xf32>
    %3 = tpu.matmul %1, %2, %cst {dimension_numbers = #tpu.dot_dimension_numbers<[1], [0], [0], [1], [0, 0, 1, 1], [], []>} : vector<16x32xbf16>, vector<32x32xbf16>, vector<16x32xf32> -> vector<16x32xf32>
    %c0_3 = arith.constant 0 : index
    %c0_4 = arith.constant 0 : index
    %4 = vector.load %arg4[%c0_3, %c0_4] : memref<1x32xf32, #tpu.memory_space<vmem>>, vector<1x32xf32>
    %5 = vector.broadcast %4 : vector<1x32xf32> to vector<16x32xf32>
    %6 = arith.addf %3, %5 : vector<16x32xf32>
    %c0_5 = arith.constant 0 : index
    %c0_6 = arith.constant 0 : index
    %7 = vector.load %arg5[%c0_5, %c0_6] : memref<16x32xf32, #tpu.memory_space<vmem>>, vector<16x32xf32>
    tpu.vector_store %arg5[%c0_5, %c0_6], %6 {strides = array<i32>} : memref<16x32xf32, #tpu.memory_space<vmem>>, vector<16x32xf32>,
    return
  }
  func.func @transform_0(%arg0: i32, %arg1: i32) -> (i32, i32) {
    %c0_i32 = arith.constant 0 : i32
    %c0_i32_0 = arith.constant 0 : i32
    return %arg0, %c0_i32 : i32, i32
  }
  func.func @transform_1(%arg0: i32, %arg1: i32) -> (i32, i32) {
    %c0_i32 = arith.constant 0 : i32
    %c0_i32_0 = arith.constant 0 : i32
    return %c0_i32, %arg1 : i32, i32
  }
  func.func @transform_2(%arg0: i32, %arg1: i32) -> (i32, i32) {
    %c0_i32 = arith.constant 0 : i32
    %c0_i32_0 = arith.constant 0 : i32
    return %c0_i32, %arg1 : i32, i32
  }
  func.func @transform_3(%arg0: i32, %arg1: i32) -> (i32, i32) {
    %c0_i32 = arith.constant 0 : i32
    return %arg0, %arg1 : i32, i32
  }
}

module attributes {stable_mosaic.version = 11 : i64} {
  func.func @_proj_add_ln_kernel(%arg0: i32, %arg1: memref<16x32xf32, #tpu.memory_space<vmem>>, %arg2: memref<32x32xbf16, #tpu.memory_space<vmem>>, %arg3: memref<1x32xf32, #tpu.memory_space<vmem>>, %arg4: memref<16x32xf32, #tpu.memory_space<vmem>>, %arg5: memref<1x32xf32, #tpu.memory_space<vmem>>, %arg6: memref<1x32xf32, #tpu.memory_space<vmem>>, %arg7: memref<16x32xf32, #tpu.memory_space<vmem>>) attributes {dimension_semantics = [#tpu.dimension_semantics<parallel>], iteration_bounds = array<i64: 1>, scalar_prefetch = 0 : i64, scratch_operands = 0 : i64, tpu.core_type = #tpu.core_type<tc>, window_params = [{transform_indices = @transform_0, window_bounds = array<i64: 16, 32>}, {pipeline_mode = #tpu.pipeline_mode<synchronous>, transform_indices = @transform_1, window_bounds = array<i64: 32, 32>}, {pipeline_mode = #tpu.pipeline_mode<synchronous>, transform_indices = @transform_2, window_bounds = array<i64: 1, 32>}, {transform_indices = @transform_3, window_bounds = array<i64: 16, 32>}, {pipeline_mode = #tpu.pipeline_mode<synchronous>, transform_indices = @transform_4, window_bounds = array<i64: 1, 32>}, {pipeline_mode = #tpu.pipeline_mode<synchronous>, transform_indices = @transform_5, window_bounds = array<i64: 1, 32>}, {transform_indices = @transform_6, window_bounds = array<i64: 16, 32>}]} {
    %c0 = arith.constant 0 : index
    %c0_0 = arith.constant 0 : index
    %0 = vector.load %arg1[%c0, %c0_0] : memref<16x32xf32, #tpu.memory_space<vmem>>, vector<16x32xf32>
    %1 = arith.truncf %0 : vector<16x32xf32> to vector<16x32xbf16>
    %c0_1 = arith.constant 0 : index
    %c0_2 = arith.constant 0 : index
    %2 = vector.load %arg2[%c0_1, %c0_2] : memref<32x32xbf16, #tpu.memory_space<vmem>>, vector<32x32xbf16>
    %cst = arith.constant dense<0.000000e+00> : vector<16x32xf32>
    %3 = tpu.matmul %1, %2, %cst {dimension_numbers = #tpu.dot_dimension_numbers<[1], [0], [0], [1], [0, 0, 1, 1], [], []>} : vector<16x32xbf16>, vector<32x32xbf16>, vector<16x32xf32> -> vector<16x32xf32>
    %c0_3 = arith.constant 0 : index
    %c0_4 = arith.constant 0 : index
    %4 = vector.load %arg3[%c0_3, %c0_4] : memref<1x32xf32, #tpu.memory_space<vmem>>, vector<1x32xf32>
    %5 = vector.broadcast %4 : vector<1x32xf32> to vector<16x32xf32>
    %6 = arith.addf %3, %5 : vector<16x32xf32>
    %c0_5 = arith.constant 0 : index
    %c0_6 = arith.constant 0 : index
    %7 = vector.load %arg4[%c0_5, %c0_6] : memref<16x32xf32, #tpu.memory_space<vmem>>, vector<16x32xf32>
    %8 = arith.addf %6, %7 : vector<16x32xf32>
    %c0_7 = arith.constant 0 : index
    %c0_8 = arith.constant 0 : index
    %9 = vector.load %arg5[%c0_7, %c0_8] : memref<1x32xf32, #tpu.memory_space<vmem>>, vector<1x32xf32>
    %c0_9 = arith.constant 0 : index
    %c0_10 = arith.constant 0 : index
    %10 = vector.load %arg6[%c0_9, %c0_10] : memref<1x32xf32, #tpu.memory_space<vmem>>, vector<1x32xf32>
    %cst_11 = arith.constant dense<0.000000e+00> : vector<16xf32>
    %11 = vector.multi_reduction <add>, %8, %cst_11 [1] : vector<16x32xf32> to vector<16xf32>
    %12 = vector.shape_cast %11 : vector<16xf32> to vector<16x1xf32>
    %cst_12 = arith.constant 3.200000e+01 : f32
    %13 = vector.broadcast %cst_12 : f32 to vector<16x1xf32>
    %14 = arith.divf %12, %13 : vector<16x1xf32>
    %15 = vector.broadcast %14 : vector<16x1xf32> to vector<16x32xf32>
    %16 = arith.subf %8, %15 : vector<16x32xf32>
    %17 = arith.mulf %16, %16 : vector<16x32xf32>
    %cst_13 = arith.constant dense<0.000000e+00> : vector<16xf32>
    %18 = vector.multi_reduction <add>, %17, %cst_13 [1] : vector<16x32xf32> to vector<16xf32>
    %19 = vector.shape_cast %18 : vector<16xf32> to vector<16x1xf32>
    %cst_14 = arith.constant 3.200000e+01 : f32
    %20 = vector.broadcast %cst_14 : f32 to vector<16x1xf32>
    %21 = arith.divf %19, %20 : vector<16x1xf32>
    %22 = vector.broadcast %14 : vector<16x1xf32> to vector<16x32xf32>
    %23 = arith.subf %8, %22 : vector<16x32xf32>
    %cst_15 = arith.constant 9.99999997E-7 : f32
    %24 = vector.broadcast %cst_15 : f32 to vector<16x1xf32>
    %25 = arith.addf %21, %24 : vector<16x1xf32>
    %26 = math.rsqrt %25 : vector<16x1xf32>
    %27 = vector.broadcast %26 : vector<16x1xf32> to vector<16x32xf32>
    %28 = arith.mulf %23, %27 : vector<16x32xf32>
    %29 = vector.broadcast %9 : vector<1x32xf32> to vector<16x32xf32>
    %30 = arith.mulf %28, %29 : vector<16x32xf32>
    %31 = vector.broadcast %10 : vector<1x32xf32> to vector<16x32xf32>
    %32 = arith.addf %30, %31 : vector<16x32xf32>
    %c0_16 = arith.constant 0 : index
    %c0_17 = arith.constant 0 : index
    %33 = vector.load %arg7[%c0_16, %c0_17] : memref<16x32xf32, #tpu.memory_space<vmem>>, vector<16x32xf32>
    tpu.vector_store %arg7[%c0_16, %c0_17], %32 {strides = array<i32>} : memref<16x32xf32, #tpu.memory_space<vmem>>, vector<16x32xf32>,
    return
  }
  func.func @transform_0(%arg0: i32) -> (i32, i32) {
    %c0_i32 = arith.constant 0 : i32
    %c0_i32_0 = arith.constant 0 : i32
    return %arg0, %c0_i32 : i32, i32
  }
  func.func @transform_1(%arg0: i32) -> (i32, i32) {
    %c0_i32 = arith.constant 0 : i32
    %c0_i32_0 = arith.constant 0 : i32
    %c0_i32_1 = arith.constant 0 : i32
    return %c0_i32, %c0_i32_0 : i32, i32
  }
  func.func @transform_2(%arg0: i32) -> (i32, i32) {
    %c0_i32 = arith.constant 0 : i32
    %c0_i32_0 = arith.constant 0 : i32
    %c0_i32_1 = arith.constant 0 : i32
    return %c0_i32, %c0_i32_0 : i32, i32
  }
  func.func @transform_3(%arg0: i32) -> (i32, i32) {
    %c0_i32 = arith.constant 0 : i32
    %c0_i32_0 = arith.constant 0 : i32
    return %arg0, %c0_i32 : i32, i32
  }
  func.func @transform_4(%arg0: i32) -> (i32, i32) {
    %c0_i32 = arith.constant 0 : i32
    %c0_i32_0 = arith.constant 0 : i32
    %c0_i32_1 = arith.constant 0 : i32
    return %c0_i32, %c0_i32_0 : i32, i32
  }
  func.func @transform_5(%arg0: i32) -> (i32, i32) {
    %c0_i32 = arith.constant 0 : i32
    %c0_i32_0 = arith.constant 0 : i32
    %c0_i32_1 = arith.constant 0 : i32
    return %c0_i32, %c0_i32_0 : i32, i32
  }
  func.func @transform_6(%arg0: i32) -> (i32, i32) {
    %c0_i32 = arith.constant 0 : i32
    %c0_i32_0 = arith.constant 0 : i32
    return %arg0, %c0_i32 : i32, i32
  }
}

module attributes {stable_mosaic.version = 11 : i64} {
  func.func @_linear_kernel(%arg0: i32, %arg1: i32, %arg2: memref<16x32xf32, #tpu.memory_space<vmem>>, %arg3: memref<32x64xbf16, #tpu.memory_space<vmem>>, %arg4: memref<1x64xf32, #tpu.memory_space<vmem>>, %arg5: memref<16x64xf32, #tpu.memory_space<vmem>>) attributes {dimension_semantics = [#tpu.dimension_semantics<parallel>, #tpu.dimension_semantics<parallel>], iteration_bounds = array<i64: 1, 1>, scalar_prefetch = 0 : i64, scratch_operands = 0 : i64, tpu.core_type = #tpu.core_type<tc>, window_params = [{transform_indices = @transform_0, window_bounds = array<i64: 16, 32>}, {transform_indices = @transform_1, window_bounds = array<i64: 32, 64>}, {transform_indices = @transform_2, window_bounds = array<i64: 1, 64>}, {transform_indices = @transform_3, window_bounds = array<i64: 16, 64>}]} {
    %c0 = arith.constant 0 : index
    %c0_0 = arith.constant 0 : index
    %0 = vector.load %arg2[%c0, %c0_0] : memref<16x32xf32, #tpu.memory_space<vmem>>, vector<16x32xf32>
    %1 = arith.truncf %0 : vector<16x32xf32> to vector<16x32xbf16>
    %c0_1 = arith.constant 0 : index
    %c0_2 = arith.constant 0 : index
    %2 = vector.load %arg3[%c0_1, %c0_2] : memref<32x64xbf16, #tpu.memory_space<vmem>>, vector<32x64xbf16>
    %cst = arith.constant dense<0.000000e+00> : vector<16x64xf32>
    %3 = tpu.matmul %1, %2, %cst {dimension_numbers = #tpu.dot_dimension_numbers<[1], [0], [0], [1], [0, 0, 1, 1], [], []>} : vector<16x32xbf16>, vector<32x64xbf16>, vector<16x64xf32> -> vector<16x64xf32>
    %c0_3 = arith.constant 0 : index
    %c0_4 = arith.constant 0 : index
    %4 = vector.load %arg4[%c0_3, %c0_4] : memref<1x64xf32, #tpu.memory_space<vmem>>, vector<1x64xf32>
    %5 = vector.broadcast %4 : vector<1x64xf32> to vector<16x64xf32>
    %6 = arith.addf %3, %5 : vector<16x64xf32>
    %c0_5 = arith.constant 0 : index
    %c0_6 = arith.constant 0 : index
    %7 = vector.load %arg5[%c0_5, %c0_6] : memref<16x64xf32, #tpu.memory_space<vmem>>, vector<16x64xf32>
    tpu.vector_store %arg5[%c0_5, %c0_6], %6 {strides = array<i32>} : memref<16x64xf32, #tpu.memory_space<vmem>>, vector<16x64xf32>,
    return
  }
  func.func @transform_0(%arg0: i32, %arg1: i32) -> (i32, i32) {
    %c0_i32 = arith.constant 0 : i32
    %c0_i32_0 = arith.constant 0 : i32
    return %arg0, %c0_i32 : i32, i32
  }
  func.func @transform_1(%arg0: i32, %arg1: i32) -> (i32, i32) {
    %c0_i32 = arith.constant 0 : i32
    %c0_i32_0 = arith.constant 0 : i32
    return %c0_i32, %arg1 : i32, i32
  }
  func.func @transform_2(%arg0: i32, %arg1: i32) -> (i32, i32) {
    %c0_i32 = arith.constant 0 : i32
    %c0_i32_0 = arith.constant 0 : i32
    return %c0_i32, %arg1 : i32, i32
  }
  func.func @transform_3(%arg0: i32, %arg1: i32) -> (i32, i32) {
    %c0_i32 = arith.constant 0 : i32
    return %arg0, %arg1 : i32, i32
  }
}

module attributes {stable_mosaic.version = 11 : i64} {
  func.func @kernel(%arg0: i32, %arg1: i32, %arg2: memref<1x8x32xf32, #tpu.memory_space<vmem>>, %arg3: memref<1x8x64xf32, #tpu.memory_space<vmem>>, %arg4: memref<1x8x32xf32, #tpu.memory_space<vmem>>, %arg5: memref<1x4x8x8xf32, #tpu.memory_space<vmem>>) attributes {dimension_semantics = [#tpu.dimension_semantics<parallel>, #tpu.dimension_semantics<parallel>], iteration_bounds = array<i64: 2, 1>, scalar_prefetch = 0 : i64, scratch_operands = 0 : i64, tpu.core_type = #tpu.core_type<tc>, window_params = [{transform_indices = @transform_0, window_bounds = array<i64: 1, 8, 32>}, {transform_indices = @transform_1, window_bounds = array<i64: 1, 8, 64>}, {transform_indices = @transform_2, window_bounds = array<i64: 1, 8, 32>}, {transform_indices = @transform_3, window_bounds = array<i64: 1, 4, 8, 8>}]} {
    %c0 = arith.constant 0 : index
    %c0_0 = arith.constant 0 : index
    %c0_1 = arith.constant 0 : index
    %0 = vector.load %arg3[%c0, %c0_0, %c0_1] : memref<1x8x64xf32, #tpu.memory_space<vmem>>, vector<1x8x64xf32>
    %1 = vector.shape_cast %0 : vector<1x8x64xf32> to vector<8x64xf32>
    %c0_2 = arith.constant 0 : index
    %c0_3 = arith.constant 0 : index
    %c0_4 = arith.constant 0 : index
    %2 = vector.load %arg2[%c0_2, %c0_3, %c0_4] : memref<1x8x32xf32, #tpu.memory_space<vmem>>, vector<1x8x32xf32>
    %3 = vector.shape_cast %2 : vector<1x8x32xf32> to vector<8x32xf32>
    %4 = vector.extract_strided_slice %1 {offsets = [0, 0], sizes = [8, 32], strides = [1, 1]} : vector<8x64xf32> to vector<8x32xf32>
    %5 = vector.extract_strided_slice %1 {offsets = [0, 32], sizes = [8, 32], strides = [1, 1]} : vector<8x64xf32> to vector<8x32xf32>
    %6 = vector.extract_strided_slice %3 {offsets = [0, 0], sizes = [8, 8], strides = [1, 1]} : vector<8x32xf32> to vector<8x8xf32>
    %7 = arith.truncf %6 : vector<8x8xf32> to vector<8x8xbf16>
    %8 = vector.extract_strided_slice %4 {offsets = [0, 0], sizes = [8, 8], strides = [1, 1]} : vector<8x32xf32> to vector<8x8xf32>
    %9 = arith.truncf %8 : vector<8x8xf32> to vector<8x8xbf16>
    %10 = vector.extract_strided_slice %5 {offsets = [0, 0], sizes = [8, 8], strides = [1, 1]} : vector<8x32xf32> to vector<8x8xf32>
    %11 = arith.truncf %10 : vector<8x8xf32> to vector<8x8xbf16>
    %cst = arith.constant dense<0.000000e+00> : vector<8x8xf32>
    %12 = tpu.matmul %7, %9, %cst {dimension_numbers = #tpu.dot_dimension_numbers<[1], [1], [0], [0], [0, 0, 1, 0], [], []>} : vector<8x8xbf16>, vector<8x8xbf16>, vector<8x8xf32> -> vector<8x8xf32>
    %cst_5 = arith.constant 0.353553385 : f32
    %13 = vector.broadcast %cst_5 : f32 to vector<8x8xf32>
    %14 = arith.mulf %12, %13 : vector<8x8xf32>
    %cst_6 = arith.constant dense<0xFF800000> : vector<8xf32>
    %15 = vector.multi_reduction <maximumf>, %14, %cst_6 [1] : vector<8x8xf32> to vector<8xf32>
    %16 = vector.shape_cast %15 : vector<8xf32> to vector<8x1xf32>
    %17 = vector.broadcast %16 : vector<8x1xf32> to vector<8x8xf32>
    %18 = arith.subf %14, %17 : vector<8x8xf32>
    %19 = math.exp %18 : vector<8x8xf32>
    %cst_7 = arith.constant dense<0.000000e+00> : vector<8xf32>
    %20 = vector.multi_reduction <add>, %19, %cst_7 [1] : vector<8x8xf32> to vector<8xf32>
    %21 = vector.shape_cast %20 : vector<8xf32> to vector<8x1xf32>
    %22 = tpu.reciprocal %21 {approx = true} : vector<8x1xf32> -> vector<8x1xf32>
    %23 = vector.broadcast %22 : vector<8x1xf32> to vector<8x8xf32>
    %24 = arith.mulf %19, %23 : vector<8x8xf32>
    %c0_8 = arith.constant 0 : index
    %c0_9 = arith.constant 0 : index
    %c0_10 = arith.constant 0 : index
    %c0_11 = arith.constant 0 : index
    %25 = vector.load %arg5[%c0_8, %c0_9, %c0_10, %c0_11] : memref<1x4x8x8xf32, #tpu.memory_space<vmem>>, vector<1x1x8x8xf32>
    %26 = vector.shape_cast %25 : vector<1x1x8x8xf32> to vector<8x8xf32>
    %27 = vector.shape_cast %24 : vector<8x8xf32> to vector<1x1x8x8xf32>
    tpu.vector_store %arg5[%c0_8, %c0_9, %c0_10, %c0_11], %27 {strides = array<i32>} : memref<1x4x8x8xf32, #tpu.memory_space<vmem>>, vector<1x1x8x8xf32>,
    %28 = arith.truncf %24 : vector<8x8xf32> to vector<8x8xbf16>
    %cst_12 = arith.constant dense<0.000000e+00> : vector<8x8xf32>
    %29 = tpu.matmul %28, %11, %cst_12 {dimension_numbers = #tpu.dot_dimension_numbers<[1], [0], [0], [1], [0, 0, 1, 1], [], []>} : vector<8x8xbf16>, vector<8x8xbf16>, vector<8x8xf32> -> vector<8x8xf32>
    %c0_13 = arith.constant 0 : index
    %c0_14 = arith.constant 0 : index
    %c0_15 = arith.constant 0 : index
    %30 = vector.load %arg4[%c0_13, %c0_14, %c0_15] : memref<1x8x32xf32, #tpu.memory_space<vmem>>, vector<1x8x8xf32>
    %31 = vector.shape_cast %30 : vector<1x8x8xf32> to vector<8x8xf32>
    %32 = vector.shape_cast %29 : vector<8x8xf32> to vector<1x8x8xf32>
    tpu.vector_store %arg4[%c0_13, %c0_14, %c0_15], %32 {strides = array<i32>} : memref<1x8x32xf32, #tpu.memory_space<vmem>>, vector<1x8x8xf32>,
    %33 = vector.extract_strided_slice %3 {offsets = [0, 8], sizes = [8, 8], strides = [1, 1]} : vector<8x32xf32> to vector<8x8xf32>
    %34 = arith.truncf %33 : vector<8x8xf32> to vector<8x8xbf16>
    %35 = vector.extract_strided_slice %4 {offsets = [0, 8], sizes = [8, 8], strides = [1, 1]} : vector<8x32xf32> to vector<8x8xf32>
    %36 = arith.truncf %35 : vector<8x8xf32> to vector<8x8xbf16>
    %37 = vector.extract_strided_slice %5 {offsets = [0, 8], sizes = [8, 8], strides = [1, 1]} : vector<8x32xf32> to vector<8x8xf32>
    %38 = arith.truncf %37 : vector<8x8xf32> to vector<8x8xbf16>
    %cst_16 = arith.constant dense<0.000000e+00> : vector<8x8xf32>
    %39 = tpu.matmul %34, %36, %cst_16 {dimension_numbers = #tpu.dot_dimension_numbers<[1], [1], [0], [0], [0, 0, 1, 0], [], []>} : vector<8x8xbf16>, vector<8x8xbf16>, vector<8x8xf32> -> vector<8x8xf32>
    %cst_17 = arith.constant 0.353553385 : f32
    %40 = vector.broadcast %cst_17 : f32 to vector<8x8xf32>
    %41 = arith.mulf %39, %40 : vector<8x8xf32>
    %cst_18 = arith.constant dense<0xFF800000> : vector<8xf32>
    %42 = vector.multi_reduction <maximumf>, %41, %cst_18 [1] : vector<8x8xf32> to vector<8xf32>
    %43 = vector.shape_cast %42 : vector<8xf32> to vector<8x1xf32>
    %44 = vector.broadcast %43 : vector<8x1xf32> to vector<8x8xf32>
    %45 = arith.subf %41, %44 : vector<8x8xf32>
    %46 = math.exp %45 : vector<8x8xf32>
    %cst_19 = arith.constant dense<0.000000e+00> : vector<8xf32>
    %47 = vector.multi_reduction <add>, %46, %cst_19 [1] : vector<8x8xf32> to vector<8xf32>
    %48 = vector.shape_cast %47 : vector<8xf32> to vector<8x1xf32>
    %49 = tpu.reciprocal %48 {approx = true} : vector<8x1xf32> -> vector<8x1xf32>
    %50 = vector.broadcast %49 : vector<8x1xf32> to vector<8x8xf32>
    %51 = arith.mulf %46, %50 : vector<8x8xf32>
    %c0_20 = arith.constant 0 : index
    %c1 = arith.constant 1 : index
    %c0_21 = arith.constant 0 : index
    %c0_22 = arith.constant 0 : index
    %52 = vector.load %arg5[%c0_20, %c1, %c0_21, %c0_22] : memref<1x4x8x8xf32, #tpu.memory_space<vmem>>, vector<1x1x8x8xf32>
    %53 = vector.shape_cast %52 : vector<1x1x8x8xf32> to vector<8x8xf32>
    %54 = vector.shape_cast %51 : vector<8x8xf32> to vector<1x1x8x8xf32>
    tpu.vector_store %arg5[%c0_20, %c1, %c0_21, %c0_22], %54 {strides = array<i32>} : memref<1x4x8x8xf32, #tpu.memory_space<vmem>>, vector<1x1x8x8xf32>,
    %55 = arith.truncf %51 : vector<8x8xf32> to vector<8x8xbf16>
    %cst_23 = arith.constant dense<0.000000e+00> : vector<8x8xf32>
    %56 = tpu.matmul %55, %38, %cst_23 {dimension_numbers = #tpu.dot_dimension_numbers<[1], [0], [0], [1], [0, 0, 1, 1], [], []>} : vector<8x8xbf16>, vector<8x8xbf16>, vector<8x8xf32> -> vector<8x8xf32>
    %c0_24 = arith.constant 0 : index
    %c0_25 = arith.constant 0 : index
    %c8 = arith.constant 8 : index
    %57 = vector.load %arg4[%c0_24, %c0_25, %c8] : memref<1x8x32xf32, #tpu.memory_space<vmem>>, vector<1x8x8xf32>
    %58 = vector.shape_cast %57 : vector<1x8x8xf32> to vector<8x8xf32>
    %59 = vector.shape_cast %56 : vector<8x8xf32> to vector<1x8x8xf32>
    tpu.vector_store %arg4[%c0_24, %c0_25, %c8], %59 {strides = array<i32>} : memref<1x8x32xf32, #tpu.memory_space<vmem>>, vector<1x8x8xf32>,
    %60 = vector.extract_strided_slice %3 {offsets = [0, 16], sizes = [8, 8], strides = [1, 1]} : vector<8x32xf32> to vector<8x8xf32>
    %61 = arith.truncf %60 : vector<8x8xf32> to vector<8x8xbf16>
    %62 = vector.extract_strided_slice %4 {offsets = [0, 16], sizes = [8, 8], strides = [1, 1]} : vector<8x32xf32> to vector<8x8xf32>
    %63 = arith.truncf %62 : vector<8x8xf32> to vector<8x8xbf16>
    %64 = vector.extract_strided_slice %5 {offsets = [0, 16], sizes = [8, 8], strides = [1, 1]} : vector<8x32xf32> to vector<8x8xf32>
    %65 = arith.truncf %64 : vector<8x8xf32> to vector<8x8xbf16>
    %cst_26 = arith.constant dense<0.000000e+00> : vector<8x8xf32>
    %66 = tpu.matmul %61, %63, %cst_26 {dimension_numbers = #tpu.dot_dimension_numbers<[1], [1], [0], [0], [0, 0, 1, 0], [], []>} : vector<8x8xbf16>, vector<8x8xbf16>, vector<8x8xf32> -> vector<8x8xf32>
    %cst_27 = arith.constant 0.353553385 : f32
    %67 = vector.broadcast %cst_27 : f32 to vector<8x8xf32>
    %68 = arith.mulf %66, %67 : vector<8x8xf32>
    %cst_28 = arith.constant dense<0xFF800000> : vector<8xf32>
    %69 = vector.multi_reduction <maximumf>, %68, %cst_28 [1] : vector<8x8xf32> to vector<8xf32>
    %70 = vector.shape_cast %69 : vector<8xf32> to vector<8x1xf32>
    %71 = vector.broadcast %70 : vector<8x1xf32> to vector<8x8xf32>
    %72 = arith.subf %68, %71 : vector<8x8xf32>
    %73 = math.exp %72 : vector<8x8xf32>
    %cst_29 = arith.constant dense<0.000000e+00> : vector<8xf32>
    %74 = vector.multi_reduction <add>, %73, %cst_29 [1] : vector<8x8xf32> to vector<8xf32>
    %75 = vector.shape_cast %74 : vector<8xf32> to vector<8x1xf32>
    %76 = tpu.reciprocal %75 {approx = true} : vector<8x1xf32> -> vector<8x1xf32>
    %77 = vector.broadcast %76 : vector<8x1xf32> to vector<8x8xf32>
    %78 = arith.mulf %73, %77 : vector<8x8xf32>
    %c0_30 = arith.constant 0 : index
    %c2 = arith.constant 2 : index
    %c0_31 = arith.constant 0 : index
    %c0_32 = arith.constant 0 : index
    %79 = vector.load %arg5[%c0_30, %c2, %c0_31, %c0_32] : memref<1x4x8x8xf32, #tpu.memory_space<vmem>>, vector<1x1x8x8xf32>
    %80 = vector.shape_cast %79 : vector<1x1x8x8xf32> to vector<8x8xf32>
    %81 = vector.shape_cast %78 : vector<8x8xf32> to vector<1x1x8x8xf32>
    tpu.vector_store %arg5[%c0_30, %c2, %c0_31, %c0_32], %81 {strides = array<i32>} : memref<1x4x8x8xf32, #tpu.memory_space<vmem>>, vector<1x1x8x8xf32>,
    %82 = arith.truncf %78 : vector<8x8xf32> to vector<8x8xbf16>
    %cst_33 = arith.constant dense<0.000000e+00> : vector<8x8xf32>
    %83 = tpu.matmul %82, %65, %cst_33 {dimension_numbers = #tpu.dot_dimension_numbers<[1], [0], [0], [1], [0, 0, 1, 1], [], []>} : vector<8x8xbf16>, vector<8x8xbf16>, vector<8x8xf32> -> vector<8x8xf32>
    %c0_34 = arith.constant 0 : index
    %c0_35 = arith.constant 0 : index
    %c16 = arith.constant 16 : index
    %84 = vector.load %arg4[%c0_34, %c0_35, %c16] : memref<1x8x32xf32, #tpu.memory_space<vmem>>, vector<1x8x8xf32>
    %85 = vector.shape_cast %84 : vector<1x8x8xf32> to vector<8x8xf32>
    %86 = vector.shape_cast %83 : vector<8x8xf32> to vector<1x8x8xf32>
    tpu.vector_store %arg4[%c0_34, %c0_35, %c16], %86 {strides = array<i32>} : memref<1x8x32xf32, #tpu.memory_space<vmem>>, vector<1x8x8xf32>,
    %87 = vector.extract_strided_slice %3 {offsets = [0, 24], sizes = [8, 8], strides = [1, 1]} : vector<8x32xf32> to vector<8x8xf32>
    %88 = arith.truncf %87 : vector<8x8xf32> to vector<8x8xbf16>
    %89 = vector.extract_strided_slice %4 {offsets = [0, 24], sizes = [8, 8], strides = [1, 1]} : vector<8x32xf32> to vector<8x8xf32>
    %90 = arith.truncf %89 : vector<8x8xf32> to vector<8x8xbf16>
    %91 = vector.extract_strided_slice %5 {offsets = [0, 24], sizes = [8, 8], strides = [1, 1]} : vector<8x32xf32> to vector<8x8xf32>
    %92 = arith.truncf %91 : vector<8x8xf32> to vector<8x8xbf16>
    %cst_36 = arith.constant dense<0.000000e+00> : vector<8x8xf32>
    %93 = tpu.matmul %88, %90, %cst_36 {dimension_numbers = #tpu.dot_dimension_numbers<[1], [1], [0], [0], [0, 0, 1, 0], [], []>} : vector<8x8xbf16>, vector<8x8xbf16>, vector<8x8xf32> -> vector<8x8xf32>
    %cst_37 = arith.constant 0.353553385 : f32
    %94 = vector.broadcast %cst_37 : f32 to vector<8x8xf32>
    %95 = arith.mulf %93, %94 : vector<8x8xf32>
    %cst_38 = arith.constant dense<0xFF800000> : vector<8xf32>
    %96 = vector.multi_reduction <maximumf>, %95, %cst_38 [1] : vector<8x8xf32> to vector<8xf32>
    %97 = vector.shape_cast %96 : vector<8xf32> to vector<8x1xf32>
    %98 = vector.broadcast %97 : vector<8x1xf32> to vector<8x8xf32>
    %99 = arith.subf %95, %98 : vector<8x8xf32>
    %100 = math.exp %99 : vector<8x8xf32>
    %cst_39 = arith.constant dense<0.000000e+00> : vector<8xf32>
    %101 = vector.multi_reduction <add>, %100, %cst_39 [1] : vector<8x8xf32> to vector<8xf32>
    %102 = vector.shape_cast %101 : vector<8xf32> to vector<8x1xf32>
    %103 = tpu.reciprocal %102 {approx = true} : vector<8x1xf32> -> vector<8x1xf32>
    %104 = vector.broadcast %103 : vector<8x1xf32> to vector<8x8xf32>
    %105 = arith.mulf %100, %104 : vector<8x8xf32>
    %c0_40 = arith.constant 0 : index
    %c3 = arith.constant 3 : index
    %c0_41 = arith.constant 0 : index
    %c0_42 = arith.constant 0 : index
    %106 = vector.load %arg5[%c0_40, %c3, %c0_41, %c0_42] : memref<1x4x8x8xf32, #tpu.memory_space<vmem>>, vector<1x1x8x8xf32>
    %107 = vector.shape_cast %106 : vector<1x1x8x8xf32> to vector<8x8xf32>
    %108 = vector.shape_cast %105 : vector<8x8xf32> to vector<1x1x8x8xf32>
    tpu.vector_store %arg5[%c0_40, %c3, %c0_41, %c0_42], %108 {strides = array<i32>} : memref<1x4x8x8xf32, #tpu.memory_space<vmem>>, vector<1x1x8x8xf32>,
    %109 = arith.truncf %105 : vector<8x8xf32> to vector<8x8xbf16>
    %cst_43 = arith.constant dense<0.000000e+00> : vector<8x8xf32>
    %110 = tpu.matmul %109, %92, %cst_43 {dimension_numbers = #tpu.dot_dimension_numbers<[1], [0], [0], [1], [0, 0, 1, 1], [], []>} : vector<8x8xbf16>, vector<8x8xbf16>, vector<8x8xf32> -> vector<8x8xf32>
    %c0_44 = arith.constant 0 : index
    %c0_45 = arith.constant 0 : index
    %c24 = arith.constant 24 : index
    %111 = vector.load %arg4[%c0_44, %c0_45, %c24] : memref<1x8x32xf32, #tpu.memory_space<vmem>>, vector<1x8x8xf32>
    %112 = vector.shape_cast %111 : vector<1x8x8xf32> to vector<8x8xf32>
    %113 = vector.shape_cast %110 : vector<8x8xf32> to vector<1x8x8xf32>
    tpu.vector_store %arg4[%c0_44, %c0_45, %c24], %113 {strides = array<i32>} : memref<1x8x32xf32, #tpu.memory_space<vmem>>, vector<1x8x8xf32>,
    return
  }
  func.func @transform_0(%arg0: i32, %arg1: i32) -> (i32, i32, i32) {
    %c0_i32 = arith.constant 0 : i32
    %c0_i32_0 = arith.constant 0 : i32
    return %arg0, %arg1, %c0_i32 : i32, i32, i32
  }
  func.func @transform_1(%arg0: i32, %arg1: i32) -> (i32, i32, i32) {
    %c0_i32 = arith.constant 0 : i32
    %c0_i32_0 = arith.constant 0 : i32
    %c0_i32_1 = arith.constant 0 : i32
    return %arg0, %c0_i32, %c0_i32_0 : i32, i32, i32
  }
  func.func @transform_2(%arg0: i32, %arg1: i32) -> (i32, i32, i32) {
    %c0_i32 = arith.constant 0 : i32
    %c0_i32_0 = arith.constant 0 : i32
    return %arg0, %arg1, %c0_i32 : i32, i32, i32
  }
  func.func @transform_3(%arg0: i32, %arg1: i32) -> (i32, i32, i32, i32) {
    %c0_i32 = arith.constant 0 : i32
    %c0_i32_0 = arith.constant 0 : i32
    %c0_i32_1 = arith.constant 0 : i32
    return %arg0, %c0_i32, %arg1, %c0_i32_0 : i32, i32, i32, i32
  }
}

module attributes {stable_mosaic.version = 11 : i64} {
  func.func @_ffn_add_ln_kernel(%arg0: i32, %arg1: i32, %arg2: memref<16x32xf32, #tpu.memory_space<vmem>>, %arg3: memref<32x64xbf16, #tpu.memory_space<vmem>>, %arg4: memref<1x64xf32, #tpu.memory_space<vmem>>, %arg5: memref<64x32xbf16, #tpu.memory_space<vmem>>, %arg6: memref<1x32xf32, #tpu.memory_space<vmem>>, %arg7: memref<1x32xf32, #tpu.memory_space<vmem>>, %arg8: memref<1x32xf32, #tpu.memory_space<vmem>>, %arg9: memref<16x32xf32, #tpu.memory_space<vmem>>, %arg10: memref<16x32xf32, #tpu.memory_space<vmem>>) attributes {dimension_semantics = [#tpu.dimension_semantics<parallel>, #tpu.dimension_semantics<arbitrary>], iteration_bounds = array<i64: 1, 1>, scalar_prefetch = 0 : i64, scratch_operands = 1 : i64, tpu.core_type = #tpu.core_type<tc>, window_params = [{transform_indices = @transform_0, window_bounds = array<i64: 16, 32>}, {transform_indices = @transform_1, window_bounds = array<i64: 32, 64>}, {transform_indices = @transform_2, window_bounds = array<i64: 1, 64>}, {transform_indices = @transform_3, window_bounds = array<i64: 64, 32>}, {pipeline_mode = #tpu.pipeline_mode<synchronous>, transform_indices = @transform_4, window_bounds = array<i64: 1, 32>}, {pipeline_mode = #tpu.pipeline_mode<synchronous>, transform_indices = @transform_5, window_bounds = array<i64: 1, 32>}, {pipeline_mode = #tpu.pipeline_mode<synchronous>, transform_indices = @transform_6, window_bounds = array<i64: 1, 32>}, {transform_indices = @transform_7, window_bounds = array<i64: 16, 32>}]} {
    %c0_i32 = arith.constant 0 : i32
    %0 = arith.cmpi eq, %arg1, %c0_i32 : i32
    %1 = arith.extui %0 : i1 to i32
    %c0_i32_0 = arith.constant 0 : i32
    %2 = arith.cmpi ne, %1, %c0_i32_0 : i32
    scf.if %2 {
      %cst_16 = arith.constant 0.000000e+00 : f32
      %21 = vector.broadcast %cst_16 : f32 to vector<16x32xf32>
      %c0_17 = arith.constant 0 : index
      %c0_18 = arith.constant 0 : index
      %22 = vector.load %arg10[%c0_17, %c0_18] : memref<16x32xf32, #tpu.memory_space<vmem>>, vector<16x32xf32>
      tpu.vector_store %arg10[%c0_17, %c0_18], %21 {strides = array<i32>} : memref<16x32xf32, #tpu.memory_space<vmem>>, vector<16x32xf32>,
    } else {
    }
    %c0 = arith.constant 0 : index
    %c0_1 = arith.constant 0 : index
    %3 = vector.load %arg2[%c0, %c0_1] : memref<16x32xf32, #tpu.memory_space<vmem>>, vector<16x32xf32>
    %4 = arith.truncf %3 : vector<16x32xf32> to vector<16x32xbf16>
    %c0_2 = arith.constant 0 : index
    %c0_3 = arith.constant 0 : index
    %5 = vector.load %arg3[%c0_2, %c0_3] : memref<32x64xbf16, #tpu.memory_space<vmem>>, vector<32x64xbf16>
    %cst = arith.constant dense<0.000000e+00> : vector<16x64xf32>
    %6 = tpu.matmul %4, %5, %cst {dimension_numbers = #tpu.dot_dimension_numbers<[1], [0], [0], [1], [0, 0, 1, 1], [], []>} : vector<16x32xbf16>, vector<32x64xbf16>, vector<16x64xf32> -> vector<16x64xf32>
    %c0_4 = arith.constant 0 : index
    %c0_5 = arith.constant 0 : index
    %7 = vector.load %arg4[%c0_4, %c0_5] : memref<1x64xf32, #tpu.memory_space<vmem>>, vector<1x64xf32>
    %8 = vector.broadcast %7 : vector<1x64xf32> to vector<16x64xf32>
    %9 = arith.addf %6, %8 : vector<16x64xf32>
    %cst_6 = arith.constant 0.000000e+00 : f32
    %10 = vector.broadcast %cst_6 : f32 to vector<16x64xf32>
    %11 = arith.maximumf %9, %10 : vector<16x64xf32>
    %12 = arith.truncf %11 : vector<16x64xf32> to vector<16x64xbf16>
    %c0_7 = arith.constant 0 : index
    %c0_8 = arith.constant 0 : index
    %13 = vector.load %arg10[%c0_7, %c0_8] : memref<16x32xf32, #tpu.memory_space<vmem>>, vector<16x32xf32>
    %c0_9 = arith.constant 0 : index
    %c0_10 = arith.constant 0 : index
    %14 = vector.load %arg5[%c0_9, %c0_10] : memref<64x32xbf16, #tpu.memory_space<vmem>>, vector<64x32xbf16>
    %cst_11 = arith.constant dense<0.000000e+00> : vector<16x32xf32>
    %15 = tpu.matmul %12, %14, %cst_11 {dimension_numbers = #tpu.dot_dimension_numbers<[1], [0], [0], [1], [0, 0, 1, 1], [], []>} : vector<16x64xbf16>, vector<64x32xbf16>, vector<16x32xf32> -> vector<16x32xf32>
    %16 = arith.addf %13, %15 : vector<16x32xf32>
    %c0_12 = arith.constant 0 : index
    %c0_13 = arith.constant 0 : index
    %17 = vector.load %arg10[%c0_12, %c0_13] : memref<16x32xf32, #tpu.memory_space<vmem>>, vector<16x32xf32>
    tpu.vector_store %arg10[%c0_12, %c0_13], %16 {strides = array<i32>} : memref<16x32xf32, #tpu.memory_space<vmem>>, vector<16x32xf32>,
    %c0_i32_14 = arith.constant 0 : i32
    %18 = arith.cmpi eq, %arg1, %c0_i32_14 : i32
    %19 = arith.extui %18 : i1 to i32
    %c0_i32_15 = arith.constant 0 : i32
    %20 = arith.cmpi ne, %19, %c0_i32_15 : i32
    scf.if %20 {
      %c0_16 = arith.constant 0 : index
      %c0_17 = arith.constant 0 : index
      %21 = vector.load %arg10[%c0_16, %c0_17] : memref<16x32xf32, #tpu.memory_space<vmem>>, vector<16x32xf32>
      %c0_18 = arith.constant 0 : index
      %c0_19 = arith.constant 0 : index
      %22 = vector.load %arg6[%c0_18, %c0_19] : memref<1x32xf32, #tpu.memory_space<vmem>>, vector<1x32xf32>
      %23 = vector.broadcast %22 : vector<1x32xf32> to vector<16x32xf32>
      %24 = arith.addf %21, %23 : vector<16x32xf32>
      %25 = arith.addf %24, %3 : vector<16x32xf32>
      %c0_20 = arith.constant 0 : index
      %c0_21 = arith.constant 0 : index
      %26 = vector.load %arg7[%c0_20, %c0_21] : memref<1x32xf32, #tpu.memory_space<vmem>>, vector<1x32xf32>
      %c0_22 = arith.constant 0 : index
      %c0_23 = arith.constant 0 : index
      %27 = vector.load %arg8[%c0_22, %c0_23] : memref<1x32xf32, #tpu.memory_space<vmem>>, vector<1x32xf32>
      %cst_24 = arith.constant dense<0.000000e+00> : vector<16xf32>
      %28 = vector.multi_reduction <add>, %25, %cst_24 [1] : vector<16x32xf32> to vector<16xf32>
      %29 = vector.shape_cast %28 : vector<16xf32> to vector<16x1xf32>
      %cst_25 = arith.constant 3.200000e+01 : f32
      %30 = vector.broadcast %cst_25 : f32 to vector<16x1xf32>
      %31 = arith.divf %29, %30 : vector<16x1xf32>
      %32 = vector.broadcast %31 : vector<16x1xf32> to vector<16x32xf32>
      %33 = arith.subf %25, %32 : vector<16x32xf32>
      %34 = arith.mulf %33, %33 : vector<16x32xf32>
      %cst_26 = arith.constant dense<0.000000e+00> : vector<16xf32>
      %35 = vector.multi_reduction <add>, %34, %cst_26 [1] : vector<16x32xf32> to vector<16xf32>
      %36 = vector.shape_cast %35 : vector<16xf32> to vector<16x1xf32>
      %cst_27 = arith.constant 3.200000e+01 : f32
      %37 = vector.broadcast %cst_27 : f32 to vector<16x1xf32>
      %38 = arith.divf %36, %37 : vector<16x1xf32>
      %39 = vector.broadcast %31 : vector<16x1xf32> to vector<16x32xf32>
      %40 = arith.subf %25, %39 : vector<16x32xf32>
      %cst_28 = arith.constant 9.99999997E-7 : f32
      %41 = vector.broadcast %cst_28 : f32 to vector<16x1xf32>
      %42 = arith.addf %38, %41 : vector<16x1xf32>
      %43 = math.rsqrt %42 : vector<16x1xf32>
      %44 = vector.broadcast %43 : vector<16x1xf32> to vector<16x32xf32>
      %45 = arith.mulf %40, %44 : vector<16x32xf32>
      %46 = vector.broadcast %26 : vector<1x32xf32> to vector<16x32xf32>
      %47 = arith.mulf %45, %46 : vector<16x32xf32>
      %48 = vector.broadcast %27 : vector<1x32xf32> to vector<16x32xf32>
      %49 = arith.addf %47, %48 : vector<16x32xf32>
      %c0_29 = arith.constant 0 : index
      %c0_30 = arith.constant 0 : index
      %50 = vector.load %arg9[%c0_29, %c0_30] : memref<16x32xf32, #tpu.memory_space<vmem>>, vector<16x32xf32>
      tpu.vector_store %arg9[%c0_29, %c0_30], %49 {strides = array<i32>} : memref<16x32xf32, #tpu.memory_space<vmem>>, vector<16x32xf32>,
    } else {
    }
    return
  }
  func.func @transform_0(%arg0: i32, %arg1: i32) -> (i32, i32) {
    %c0_i32 = arith.constant 0 : i32
    %c0_i32_0 = arith.constant 0 : i32
    return %arg0, %c0_i32 : i32, i32
  }
  func.func @transform_1(%arg0: i32, %arg1: i32) -> (i32, i32) {
    %c0_i32 = arith.constant 0 : i32
    %c0_i32_0 = arith.constant 0 : i32
    return %c0_i32, %arg1 : i32, i32
  }
  func.func @transform_2(%arg0: i32, %arg1: i32) -> (i32, i32) {
    %c0_i32 = arith.constant 0 : i32
    %c0_i32_0 = arith.constant 0 : i32
    return %c0_i32, %arg1 : i32, i32
  }
  func.func @transform_3(%arg0: i32, %arg1: i32) -> (i32, i32) {
    %c0_i32 = arith.constant 0 : i32
    %c0_i32_0 = arith.constant 0 : i32
    return %arg1, %c0_i32 : i32, i32
  }
  func.func @transform_4(%arg0: i32, %arg1: i32) -> (i32, i32) {
    %c0_i32 = arith.constant 0 : i32
    %c0_i32_0 = arith.constant 0 : i32
    %c0_i32_1 = arith.constant 0 : i32
    return %c0_i32, %c0_i32_0 : i32, i32
  }
  func.func @transform_5(%arg0: i32, %arg1: i32) -> (i32, i32) {
    %c0_i32 = arith.constant 0 : i32
    %c0_i32_0 = arith.constant 0 : i32
    %c0_i32_1 = arith.constant 0 : i32
    return %c0_i32, %c0_i32_0 : i32, i32
  }
  func.func @transform_6(%arg0: i32, %arg1: i32) -> (i32, i32) {
    %c0_i32 = arith.constant 0 : i32
    %c0_i32_0 = arith.constant 0 : i32
    %c0_i32_1 = arith.constant 0 : i32
    return %c0_i32, %c0_i32_0 : i32, i32
  }
  func.func @transform_7(%arg0: i32, %arg1: i32) -> (i32, i32) {
    %c0_i32 = arith.constant 0 : i32
    %c0_i32_0 = arith.constant 0 : i32
    return %arg0, %c0_i32 : i32, i32
  }
}

</mosaic_0001>

<bundles_post_ra>
// kernel: decoder_layer_forward.8
= control target key start
LH: loop header
LB: loop body
LE: loop exit
PB: predicated region body
PF: predicated region fallthrough
CT: control target
= control target key end

     0   :  { %v112_v0 = vmov 0.0   ;;  %vm113_vm0 = vmmov 0   ;;  %vm41_vm1 = vcmask 261120   ;;  %vm86_vm2 = vcmask 785408   ;;  %s155_s1 = inlined_call_operand.vmem [shape: bf16[32,96], index: 1, kind: input, shape index: {}]   ;;  %s156_s0 = inlined_call_operand.vmem [shape: f32[16,32], index: 0, kind: input, shape index: {}]   ;;  %s157_s2 = inlined_call_operand.vmem [shape: f32[1,96], index: 2, kind: input, shape index: {}]   ;;  %s158_s3 = inlined_call_operand.vmem [shape: f32[16,96], index: 3, kind: output, shape index: {}]  }
   0x1   :  { %100 = vmatprep.subr.bf16.mxu0 %v112_v0  ;;  %v110_v1 = vld [vmem:[%s155_s1] sm:$0xff]   ;;  %104 = vmatprep.mubr.msk.bf16.mxu0 %vm113_vm0, %v112_v0  ;;  %v111_v2 = vld [vmem:[%s155_s1 + $0x8] sm:$0xff]  }
   0x2   :  { %101 = vmatpush3.bf16.msra.mxu0 %v110_v1  ;;  %v15_v3 = vld [vmem:[%s156_s0] sm:$0xff]  ;;  %v16_v4 = vld [vmem:[%s156_s0 + $0x8] sm:$0xff] }
   0x3   :  { %102 = vmatprep.subr.bf16.mxu0 %v112_v0  ;;  %v17_v5 = vpack.c.bf16 %v16_v4, %v15_v3  ;;  %v93_v6 = vld [vmem:[%s157_s2] ss:$0 sm:$0xff] }
   0x6   :  { %103 = vmatpush3.bf16.msra.mxu0 %v111_v2 }
   0x9   :  { %105 = vmatmul.mubr.msk.bf16.vlgmr.msra.gmra.mrb[0].mxu0 %vm41_vm1, %v17_v5 }
  0xdc   :  { %v79_v7 = vpop.f32.mrb[0].mxu0 }
  0xdd   :  { %v80_v8 = vadd.f32 %v93_v6, %v79_v7  ;;  %v106_v9 = vpop.f32.mrb[1].mxu0 }
  0xde   :  { %v82_v10 = vpop.f32.mrb[2].mxu0 }
  0xdf   :  { %87 = vst.msk [vmem:[%s158_s3] sm:$0xff] %vm86_vm2, %v80_v8  ;;  %v83_v11 = vadd.f32 %v93_v6, %v82_v10  ;;  %v107_v12 = vpop.f32.mrb[3].mxu0 }
  0xe1   :  { %88 = vst.msk [vmem:[%s158_s3 + $0x8] sm:$0xff] %vm86_vm2, %v83_v11 }

// kernel: decoder_layer_forward.11
= control target key start
LH: loop header
LB: loop body
LE: loop exit
PB: predicated region body
PF: predicated region fallthrough
CT: control target
= control target key end

     0   :  { %v111_v0 = vmov 0.0   ;;  %vm112_vm0 = vmmov 0   ;;  %vm41_vm1 = vcmask 261120   ;;  %s154_s1 = inlined_call_operand.vmem [shape: bf16[32,32], index: 1, kind: input, shape index: {}]   ;;  %s155_s0 = inlined_call_operand.vmem [shape: f32[16,32], index: 0, kind: input, shape index: {}]   ;;  %s156_s2 = inlined_call_operand.vmem [shape: f32[1,32], index: 2, kind: input, shape index: {}]   ;;  %s157_s3 = inlined_call_operand.vmem [shape: f32[16,32], index: 3, kind: output, shape index: {}]  }
   0x1   :  { %99 = vmatprep.subr.bf16.mxu0 %v111_v0  ;;  %v109_v1 = vld [vmem:[%s154_s1] sm:$0xff]   ;;  %103 = vmatprep.mubr.msk.bf16.mxu0 %vm112_vm0, %v111_v0  ;;  %v110_v2 = vld [vmem:[%s154_s1 + $0x8] sm:$0xff]  }
   0x2   :  { %100 = vmatpush3.bf16.msra.mxu0 %v109_v1  ;;  %v15_v3 = vld [vmem:[%s155_s0] sm:$0xff]  ;;  %v16_v4 = vld [vmem:[%s155_s0 + $0x8] sm:$0xff] }
   0x3   :  { %101 = vmatprep.subr.bf16.mxu0 %v111_v0  ;;  %v17_v5 = vpack.c.bf16 %v16_v4, %v15_v3  ;;  %v92_v6 = vld [vmem:[%s156_s2] ss:$0 sm:$0xff] }
   0x6   :  { %102 = vmatpush3.bf16.msra.mxu0 %v110_v2 }
   0x9   :  { %104 = vmatmul.mubr.msk.bf16.vlgmr.msra.gmra.mrb[0].mxu0 %vm41_vm1, %v17_v5 }
  0xdc   :  { %v79_v7 = vpop.f32.mrb[0].mxu0 }
  0xdd   :  { %v80_v8 = vadd.f32 %v92_v6, %v79_v7  ;;  %v105_v9 = vpop.f32.mrb[1].mxu0 }
  0xde   :  { %v82_v10 = vpop.f32.mrb[2].mxu0 }
  0xdf   :  { %86 = vst.msk [vmem:[%s157_s3] sm:$0xff] %vm41_vm1, %v80_v8  ;;  %v83_v11 = vadd.f32 %v92_v6, %v82_v10  ;;  %v106_v12 = vpop.f32.mrb[3].mxu0 }
  0xe1   :  { %87 = vst.msk [vmem:[%s157_s3 + $0x8] sm:$0xff] %vm41_vm1, %v83_v11 }

// kernel: decoder_layer_forward.9
= control target key start
LH: loop header
LB: loop body
LE: loop exit
PB: predicated region body
PF: predicated region fallthrough
CT: control target
= control target key end

     0   :  { %8 = vsyncpa [#allocation3], 0  ;;  %s1275_s0 = inlined_call_operand.vmem [shape: f32[2,8,96], index: 0, kind: input, shape index: {}]   ;;  %s1276_s1 = inlined_call_operand.vmem [shape: f32[2,8,32], index: 1, kind: output, shape index: {0}]   ;;  %s1277_s2 = inlined_call_operand.hbm [shape: f32[2,4,8,8], index: 2, kind: output, shape index: {1}]  }
   0x1   :  { %10 = vsyncpa [#allocation3 + $0x1], 0  ;;  %s1064_s9 = smov 0   ;;  %s1066_s10 = smov 0  }
   0x2   :  { %s1068_s11 = smov 0   ;;  %s1070_s12 = smov 0  }
   0x3   :  { %s1072_s13 = smov 0   ;;  %s1074_s14 = smov 0  }
   0x4 LB: > { %s774_s15 = sadd.s32 4294967295, %s1029_s14   ;;  %s775_s16 = sadd.s32 4294967294, %s1029_s14   ;;  %s1029_s14 = sphi %s1074_s14, %s16_s14   ;;  %s1025_s13 = sphi %s1072_s13, %s1284_s13   ;;  %s1021_s12 = sphi %s1070_s12, %s1283_s12   ;;  %s1017_s11 = sphi %s1068_s11, %s1282_s11   ;;  %s1013_s10 = sphi %s1066_s10, %s1281_s10   ;;  %s1009_s9 = sphi %s1064_s9, %s1280_s9  }
   0x5   : > { %s28_s17 = sadd.s32 1, %s1025_s13  ;;  %s91_s18 = sadd.s32 1, %s1017_s11 }
   0x6   : > { %p30_p0 = scmp.ge.s32.totalorder %s28_s17, 2  ;;  %p101_p1 = scmp.ne.s32.totalorder %s1017_s11, %s1013_s10 }
   0x7   : > { %p102_p2 = scmp.eq.s32.totalorder %s774_s15, 1  ;;  %p107_p3 = scmp.ne.s32.totalorder %s1013_s10, %s1009_s9 }
   0x8   : > { %s1286_s17 = smov (%p30_p0, %s28_s17), 0  ;;  %p108_p5 = scmp.eq.s32.totalorder %s775_s16, 1 }
   0x9   : > { %p1104_p4 = por %p102_p2, %p101_p1  ;;  %s86_s20 = ssub.s32 %s1025_s13, %s1286_s17 }
   0xa   : > { %p778_p6 = scmp.ge.s32.totalorder %s1029_s14, 1  ;;  %p89_p7 = scmp.eq.s32.totalorder %s86_s20, 0 }
   0xb   : > { %p1111_p8 = por %p108_p5, %p107_p3  ;;  %p133_p9 = scmp.lt.s32.totalorder %s1029_s14, 3 }
   0xc   : > { %s1117_s22 = scalar_select %p89_p7, %s1017_s11, %s91_s18  }
   0xd   : > { %p134_p10 = pnand %p778_p6, %p133_p9 }
   0xe   : > { %p161_p11 = scmp.lt.s32.totalorder (!%p134_p10), %s1021_s12, 1  ;;  %v1031_v0 = vmov (!%p134_p10), 0.0   ;;  %vm1032_vm0 = vmmov (!%p134_p10), 0   ;;  %s1033_s28 = smov (!%p134_p10), 96   ;;  %vm178_vm1 = vcmask (!%p134_p10), 64512   ;;  %vm244_vm2 = vcmask (!%p134_p10), 1043456  }
   0xf   : > { %137 = sbr.rel (%p134_p10) target bundleno = 1609 (0x649), region = 24  ;;  %815 = vmatprep.subr.bf16.mxu0 (!%p134_p10), %v1031_v0  ;;  %817 = vmatprep.mubr.msk.bf16.mxu0 (!%p134_p10), %vm1032_vm0, %v1031_v0  ;;  %s1034_s29 = smov (!%p134_p10), 64  }
  0x10   : > { %821 = vmatprep.subr.bf16.mxu1 (!%p134_p10), %v1031_v0  ;;  %823 = vmatprep.mubr.msk.bf16.mxu1 (!%p134_p10), %vm1032_vm0, %v1031_v0  ;;  %s1035_s30 = smov (!%p134_p10), 88   ;;  %s1036_s3 = smov (!%p134_p10), 72  }
  0x11   : > { %s1037_s4 = smov (!%p134_p10), 120   ;;  %s1038_s5 = smov (!%p134_p10), 80  }
  0x12   : > { %s1039_s6 = smov (!%p134_p10), 112   ;;  %s1040_s7 = smov (!%p134_p10), 104  }
  0x13   : > { %s158_s8 = sand.u32 (!%p134_p10), 1, %s1013_s10   ;;  %s1043_s26 = smov (!%p134_p10), 40  }
  0x14   : > { %s779_s15 = sshll.u32 (!%p134_p10), %s158_s8, 5 }
  0x15   : > { %s1158_s16 = scalar_lea.vmem (!%p134_p10), [#allocation2], %s779_s15 }
  0x16   : > { %s1124_s23 = scalar_select %p161_p11, %s1021_s12, 1 }
  0x18   : > { %s780_s24 = sshll.u32 %s1124_s23, 3  ;;  %s1041_s23 = smov 56  }
  0x19   : > { %s164_s27 = scalar_lea.vmem %s1275_s0, %s780_s24  ;;  %s1182_s25 = scalar_lea.vmem %s1276_s1, %s780_s24 }
  0x1a   : > { %v173_v1 = vld [vmem:[%s164_s27] sm:$0xff]  ;;  %s1042_s24 = smov 48   ;;  %s1044_s27 = smov 8  }
  0x1b   : > { %v1135_v2 = vpack.c.bf16 %v173_v1, %v173_v1 }
  0x1d   : > { %176 = vrot.lane.b32.xlu0 %v1135_v2, %s1033_s28  ;;  %239 = vrot.lane.b32.xlu1 %v1135_v2, %s1034_s29  ;;  %s798_s28 = sshll.u32 %s1021_s12, 9  ;;  %s671_s29 = sshll.u32 %s1158_s16, 4  ;;  %s1221_s29 = int_to_ptr.vmem [resolvable:$true] %s671_s29 }
  0x1e   : > { %s1045_s12 = smov [#allocation2]  }
  0x21   : > { %291 = vrot.lane.b32.xlu1 %v1135_v2, %s1035_s30 }
  0x8f   : > { %v177_v3 = vpop.permute.xlu0 %176  ;;  %v240_v11 = vpop.permute.xlu1 %239 }
  0x90   : > { %v183_v4 = vsel %vm178_vm1, %v177_v3, 0  ;;  %v246_v12 = vsel %vm244_vm2, %v240_v11, 0 }
  0x91   : > { %816 = vmatpush3.bf16.xpose.msra.mxu0 %v183_v4  ;;  %822 = vmatpush3.bf16.msra.mxu1 %v246_v12 }
  0x92   : > { %833 = vmatprep.subr.bf16.mxu0 %v1031_v0  ;;  %827 = vmatprep.subr.bf16.mxu1 %v1031_v0 }
  0x93   : > { %v292_v18 = vpop.permute.xlu1 %291 }
  0x94   : > { %v297_v24 = vsel %vm178_vm1, %v292_v18, 0 }
  0x98   : > { %818 = vmatmul.mubr.msk.bf16.vlgmr.msra.gmra.mrb[0].mxu0 %vm178_vm1, %v1135_v2 }
  0x99   : > { %835 = vmatprep.mubr.msk.bf16.mxu0 %vm1032_vm0, %v1031_v0 }
 0x16b   : > { %v219_v5 = vpop.f32.mrb[0].mxu0 }
 0x16c   : > { %v225_v6 = vmul.f32 0.35355338, %v219_v5  ;;  %v819_v7 = vpop.f32.mrb[1].mxu0 }
 0x16d   : > { %v222_v8 = vpop.f32.mrb[2].mxu0 }
 0x16e   : > { %v820_v9 = vpop.f32.mrb[3].mxu0  ;;  %v226_v10 = vsel %vm178_vm1, %v225_v6, -inf }
 0x16f   : > { %227 = vmax.xlane.f32.xlu0 %v226_v10 }
 0x185   : > { %529 = vrot.lane.b32.xlu0 %v1135_v2, %s1036_s3 }
 0x1fc   : > { %v228_v13 = vpop.xlane.xlu0 %227 }
 0x1fd   : > { %v229_v14 = vsub.f32 %v225_v6, %v228_v13 }
 0x1ff   : > { %v230_v15 = vmul.f32 1.442695, %v229_v14 }
 0x200   : > { %v530_v27 = vpop.permute.xlu0 %529 }
 0x201   : > { %935 = vpow2.f32 %v230_v15  ;;  %v535_v29 = vsel %vm178_vm1, %v530_v27, 0 }
 0x20b   : > { %v936_v16 = vpop.eup %935 }
 0x20c   : > { %v232_v17 = vsel %vm178_vm1, %v936_v16, 0.0 }
 0x20d   : > { %233 = vadd.xlane.f32.xlu1 %v232_v17 }
 0x21e   : > { %289 = vrot.lane.b32.xlu1 %v1135_v2, %s1037_s4  ;;  %s1219_s4 = scalar_lea.hbm %s1277_s2, %s798_s28 }
 0x222   : > { %410 = vrot.lane.b32.xlu1 %v1135_v2, %s1038_s5  ;;  %s1225_s5 = scalar_lea.sflag [#allocation3], %s158_s8 }
 0x226   : > { %408 = vrot.lane.b32.xlu1 %v1135_v2, %s1039_s6  ;;  %s951_s6 = scalar_lea.vmem %s1221_s29, 512 }
 0x227   : > { %p952_p12 = scmp.ne.s32.totalorder %s1221_s29, %s951_s6 }
 0x229   : > { %p953_p13 = pnand %p952_p12, %p1104_p4 }
 0x22a   : > { %527 = vrot.lane.b32.xlu1 %v1135_v2, %s1040_s7  ;;  %s955_s7 = sshll.u32 %s1045_s12, 4  ;;  %s956_s7 = int_to_ptr.vmem [resolvable:$false] %s955_s7 }
 0x22b   : > { %p954_p0 = pneg %p953_p13  ;;  %s957_s15 = scalar_lea.vmem %s956_s7, 1024 }
 0x22c   : > { %p958_p1 = scmp.lt.s32.totalorder %s1221_s29, %s956_s7  ;;  %p959_p2 = scmp.lt.s32.totalorder %s957_s15, %s951_s6 }
 0x22e   : > { %p960_p3 = por %p959_p2, %p958_p1 }
 0x230   : > { %p961_p5 = pnand %p960_p3, %p954_p0 }
 0x29a   : > { %v234_v19 = vpop.xlane.xlu1 %233 }
 0x29b   : > { %937 = vrcp.f32 %v234_v19 }
 0x29e   : > { %v290_v22 = vpop.permute.xlu1 %289 }
 0x2a2   : > { %v411_v25 = vpop.permute.xlu1 %410 }
 0x2a3   : > { %v416_v26 = vsel %vm178_vm1, %v411_v25, 0 }
 0x2a5   : > { %v938_v20 = vpop.eup %937 }
 0x2a6   : > { %v236_v21 = vmul.f32 %v938_v20, %v936_v16  ;;  %v409_v28 = vpop.permute.xlu1 %408 }
 0x2a8   : > { %237 = vst.msk [vmem:[%s1158_s16] sm:$0xff] %vm178_vm1, %v236_v21  ;;  %v238_v23 = vpack.c.bf16 %v236_v21, %v236_v21 }
 0x2aa   : > { %824 = vmatmul.mubr.msk.bf16.vlgmr.msra.gmra.mrb[0].mxu1 %vm178_vm1, %v238_v23  ;;  %v528_v30 = vpop.permute.xlu1 %527 }
 0x2ab   : > { %828 = vmatpush3.bf16.xpose.msra.mxu1 %v297_v24  ;;  %829 = vmatprep.mubr.msk.bf16.mxu1 %vm1032_vm0, %v1031_v0 }
 0x2ac   : > { %839 = vmatprep.subr.bf16.mxu1 %v1031_v0 }
 0x2b2   : > { %830 = vmatmul.mubr.msk.bf16.vlgmr.msra.gmra.mrb[4].mxu1 %vm178_vm1, %v290_v22 }
 0x2b3   : > { %840 = vmatpush3.bf16.xpose.msra.mxu1 %v416_v26  ;;  %841 = vmatprep.mubr.msk.bf16.mxu1 %vm1032_vm0, %v1031_v0 }
 0x2b4   : > { %851 = vmatprep.subr.bf16.mxu1 %v1031_v0 }
 0x2ba   : > { %842 = vmatmul.mubr.msk.bf16.vlgmr.msra.gmra.mrb[8].mxu1 %vm178_vm1, %v409_v28 }
 0x2bb   : > { %852 = vmatpush3.bf16.xpose.msra.mxu1 %v535_v29  ;;  %853 = vmatprep.mubr.msk.bf16.mxu1 %vm1032_vm0, %v1031_v0 }
 0x2c2   : > { %854 = vmatmul.mubr.msk.bf16.vlgmr.msra.gmra.mrb[12].mxu1 %vm178_vm1, %v528_v30 }
 0x37d   : > { %v282_v31 = vpop.f32.mrb[0].mxu1 }
 0x37e   : > { %288 = vst.msk [vmem:[%s1182_s25] sm:$0xff] %vm178_vm1, %v282_v31  ;;  %v825_v32 = vpop.f32.mrb[1].mxu1 }
 0x37f   : > { %v285_v33 = vpop.f32.mrb[2].mxu1 }
 0x380   : > { %v826_v34 = vpop.f32.mrb[3].mxu1 }
 0x385   : > { %v333_v35 = vpop.f32.mrb[4].mxu1 }
 0x386   : > { %v339_v36 = vmul.f32 0.35355338, %v333_v35  ;;  %v831_v37 = vpop.f32.mrb[5].mxu1 }
 0x387   : > { %v336_v38 = vpop.f32.mrb[6].mxu1 }
 0x388   : > { %v832_v39 = vpop.f32.mrb[7].mxu1  ;;  %v340_v40 = vsel %vm178_vm1, %v339_v36, -inf }
 0x389   : > { %341 = vmax.xlane.f32.xlu1 %v340_v40 }
 0x38d   : > { %v452_v41 = vpop.f32.mrb[8].mxu1 }
 0x38e   : > { %v458_v42 = vmul.f32 0.35355338, %v452_v41  ;;  %v843_v43 = vpop.f32.mrb[9].mxu1 }
 0x38f   : > { %v455_v44 = vpop.f32.mrb[10].mxu1 }
 0x390   : > { %v459_v45 = vsel %vm178_vm1, %v458_v42, -inf  ;;  %v844_v46 = vpop.f32.mrb[11].mxu1 }
 0x391   : > { %460 = vmax.xlane.f32.xlu0 %v459_v45 }
 0x395   : > { %v571_v47 = vpop.f32.mrb[12].mxu1 }
 0x396   : > { %v577_v48 = vmul.f32 0.35355338, %v571_v47  ;;  %v855_v49 = vpop.f32.mrb[13].mxu1 }
 0x397   : > { %v574_v50 = vpop.f32.mrb[14].mxu1 }
 0x398   : > { %v578_v51 = vsel %vm178_vm1, %v577_v48, -inf  ;;  %v856_v52 = vpop.f32.mrb[15].mxu1 }
 0x399   : > { %579 = vmax.xlane.f32.xlu1 %v578_v51 }
 0x416   : > { %v342_v53 = vpop.xlane.xlu1 %341 }
 0x417   : > { %v343_v54 = vsub.f32 %v339_v36, %v342_v53 }
 0x419   : > { %v344_v55 = vmul.f32 1.442695, %v343_v54 }
 0x41b   : > { %939 = vpow2.f32 %v344_v55 }
 0x41e   : > { %v461_v63 = vpop.xlane.xlu0 %460 }
 0x41f   : > { %v462_v1 = vsub.f32 %v458_v42, %v461_v63 }
 0x421   : > { %v463_v3 = vmul.f32 1.442695, %v462_v1 }
 0x425   : > { %v940_v56 = vpop.eup %939 }
 0x426   : > { %v580_v57 = vpop.xlane.xlu1 %579  ;;  %v346_v58 = vsel %vm178_vm1, %v940_v56, 0.0 }
 0x427   : > { %v581_v59 = vsub.f32 %v577_v48, %v580_v57  ;;  %347 = vadd.xlane.f32.xlu1 %v346_v58 }
 0x429   : > { %v582_v60 = vmul.f32 1.442695, %v581_v59 }
 0x42b   : > { %941 = vpow2.f32 %v582_v60 }
 0x42c   : > { %943 = vpow2.f32 %v463_v3 }
 0x435   : > { %v942_v61 = vpop.eup %941 }
 0x436   : > { %v584_v62 = vsel %vm178_vm1, %v942_v61, 0.0  ;;  %v944_v4 = vpop.eup %943 }
 0x437   : > { %585 = vadd.xlane.f32.xlu0 %v584_v62  ;;  %v465_v5 = vsel %vm178_vm1, %v944_v4, 0.0 }
 0x438   : > { %354 = vrot.lane.b32.xlu1 %v1135_v2, %s1041_s23 }
 0x44d   : > { %473 = vrot.lane.b32.xlu0 %v1135_v2, %s1042_s24 }
 0x45c   : > { %466 = vadd.xlane.f32.xlu1 %v465_v5 }
 0x46d   : > { %592 = vrot.lane.b32.xlu1 %v1135_v2, %s1043_s26 }
 0x4b4   : > { %v348_v6 = vpop.xlane.xlu1 %347 }
 0x4b5   : > { %945 = vrcp.f32 %v348_v6 }
 0x4b8   : > { %v355_v7 = vpop.permute.xlu1 %354 }
 0x4b9   : > { %v360_v8 = vsel %vm244_vm2, %v355_v7, 0 }
 0x4ba   : > { %834 = vmatpush3.bf16.msra.mxu0 %v360_v8 }
 0x4bb   : > { %845 = vmatprep.subr.bf16.mxu0 %v1031_v0 }
 0x4bf   : > { %v946_v9 = vpop.eup %945 }
 0x4c0   : > { %v350_v10 = vmul.f32 %v946_v9, %v940_v56 }
 0x4c2   : > { %785 = vst.msk [vmem:[%s1158_s16 + $0x8] sm:$0xff] %vm178_vm1, %v350_v10  ;;  %v353_v11 = vpack.c.bf16 %v350_v10, %v350_v10 }
 0x4c4   : > { %836 = vmatmul.mubr.msk.bf16.vlgmr.msra.gmra.mrb[4].mxu0 %vm178_vm1, %v353_v11  ;;  %v586_v12 = vpop.xlane.xlu0 %585 }
 0x4c5   : > { %947 = vrcp.f32 %v586_v12  ;;  %847 = vmatprep.mubr.msk.bf16.mxu0 %vm1032_vm0, %v1031_v0 }
 0x4c8   : > { %v474_v2 = vpop.permute.xlu0 %473 }
 0x4c9   : > { %v479_v13 = vsel %vm244_vm2, %v474_v2, 0 }
 0x4ca   : > { %846 = vmatpush3.bf16.msra.mxu0 %v479_v13 }
 0x4cb   : > { %857 = vmatprep.subr.bf16.mxu0 %v1031_v0 }
 0x4cf   : > { %v948_v14 = vpop.eup %947 }
 0x4d0   : > { %v588_v15 = vmul.f32 %v948_v14, %v942_v61 }
 0x4d2   : > { %791 = vst.msk [vmem:[%s1158_s16 + $0x18] sm:$0xff] %vm178_vm1, %v588_v15  ;;  %v591_v22 = vpack.c.bf16 %v588_v15, %v588_v15 }
 0x4e9   : > { %v467_v16 = vpop.xlane.xlu1 %466 }
 0x4ea   : > { %949 = vrcp.f32 %v467_v16 }
 0x4ed   : > { %v593_v18 = vpop.permute.xlu1 %592 }
 0x4ee   : > { %v598_v20 = vsel %vm244_vm2, %v593_v18, 0 }
 0x4f4   : > { %v950_v17 = vpop.eup %949 }
 0x4f5   : > { %v469_v19 = vmul.f32 %v950_v17, %v944_v4 }
 0x4f7   : > { %788 = vst.msk [vmem:[%s1158_s16 + $0x10] sm:$0xff] %vm178_vm1, %v469_v19  ;;  %v472_v21 = vpack.c.bf16 %v469_v19, %v469_v19 }
 0x4f9   : > { %848 = vmatmul.mubr.msk.bf16.vlgmr.msra.gmra.mrb[8].mxu0 %vm178_vm1, %v472_v21 }
 0x4fa   : > { %858 = vmatpush3.bf16.msra.mxu0 %v598_v20  ;;  %859 = vmatprep.mubr.msk.bf16.mxu0 %vm1032_vm0, %v1031_v0 }
 0x501   : > { %860 = vmatmul.mubr.msk.bf16.vlgmr.msra.gmra.mrb[12].mxu0 %vm178_vm1, %v591_v22 }
 0x597   : > { %v396_v23 = vpop.f32.mrb[4].mxu0 }
 0x598   : > { %403 = vrot.lane.b32.xlu1 %v396_v23, %s1044_s27  ;;  %v837_v24 = vpop.f32.mrb[5].mxu0 }
 0x599   : > { %v399_v25 = vpop.f32.mrb[6].mxu0 }
 0x59a   : > { %v838_v26 = vpop.f32.mrb[7].mxu0 }
 0x59b   : > { %964 = shalt.err (!%p961_p5)
}
 0x59c   : > { %s965_s8 = scalar_lea.hbm %s1219_s4, 512  ;;  %s969_s20 = scalar_lea.hbm %s1277_s2, 1024 }
 0x59d   : > { %p966_p6 = scmp.ne.s32.totalorder %s1219_s4, %s965_s8  ;;  %p970_p10 = scmp.lt.u32.totalorder %s1219_s4, %s1277_s2 }
 0x59e   : > { %p971_p11 = scmp.lt.u32.totalorder %s969_s20, %s965_s8  ;;  %p973_p13 = scmp.lt.u32.totalorder %s965_s8, %s1219_s4 }
 0x59f   : > { %p967_p7 = pnand %p966_p6, %p1104_p4 }
 0x5a0   : > { %p972_p12 = por %p971_p11, %p970_p10 }
 0x5a1   : > { %p968_p9 = pneg %p967_p7 }
 0x5a2   : > { %p974_p0 = por %p973_p13, %p972_p12 }
 0x5a4   : > { %p975_p1 = pnand %p974_p0, %p968_p9 }
 0x5a6   : > { %978 = shalt.err (!%p975_p1)
}
 0x5a7   : > { %s1046_s26 = smov 128   ;;  %s1047_s28 = smov 16   ;;  %vm406_vm3 = vcmask 130112   ;;  %vm525_vm4 = vcmask 195712   ;;  %vm644_vm5 = vcmask 261312  }
 0x5a8   : > { %863 = dma.vmem_to_hbm [thread:$0]  (%p1104_p4), %s1221_s29, 512, %s1219_s4, %s1225_s5, %s1046_s26, %s1046_s26, %s1044_s27  }
 0x5a9   : > { %s1048_s30 = smov 24  }
 0x5cc   : > { %v515_v0 = vpop.f32.mrb[8].mxu0 }
 0x5cd   : > { %522 = vrot.lane.b32.xlu0 %v515_v0, %s1047_s28  ;;  %v849_v27 = vpop.f32.mrb[9].mxu0 }
 0x5ce   : > { %v518_v28 = vpop.f32.mrb[10].mxu0 }
 0x5cf   : > { %v850_v29 = vpop.f32.mrb[11].mxu0 }
 0x5d4   : > { %v634_v30 = vpop.f32.mrb[12].mxu0 }
 0x5d5   : > { %641 = vrot.lane.b32.xlu1 %v634_v30, %s1048_s30  ;;  %v861_v31 = vpop.f32.mrb[13].mxu0 }
 0x5d6   : > { %v637_v32 = vpop.f32.mrb[14].mxu0 }
 0x5d7   : > { %v862_v33 = vpop.f32.mrb[15].mxu0 }
 0x60a   : > { %v404_v34 = vpop.permute.xlu1 %403 }
 0x60b   : > { %407 = vst.msk [vmem:[%s1182_s25] sm:$0xff] %vm406_vm3, %v404_v34 }
 0x63f   : > { %v523_v35 = vpop.permute.xlu0 %522 }
 0x640   : > { %526 = vst.msk [vmem:[%s1182_s25] sm:$0xff] %vm525_vm4, %v523_v35 }
 0x647   : > { %v642_v36 = vpop.permute.xlu1 %641 }
 0x648   : > { %645 = vst.msk [vmem:[%s1182_s25] sm:$0xff] %vm644_vm5, %v642_v36 }
 0x649 PF: > { %p869_p4 = scmp.ge.s32.totalorder %s1029_s14, 2  ;;  %s696_s19 = sand.u32 1, %s1009_s9  }
 0x64a   : > { %s697_s27 = scalar_lea.sflag [#allocation3], %s696_s19 }
 0x64b   : > { %p866_p2 = pnand %p869_p4, %p1111_p8 }
 0x64d   : > { %1004 = dma.done.wait (!%p866_p2), %s697_s27, 512  }
 0x64e   : > { %1006 = vsyncadd (!%p866_p2), %s697_s27, 4294966784  ;;  %s16_s14 = sadd.s32 1, %s1029_s14   ;;  %s1280_s9 = smov %s1013_s10 }
 0x64f   : > { %p13_p3 = scmp.ge.s32.totalorder %s16_s14, 4   ;;  %s1281_s10 = smov %s1017_s11 }
 0x650   : > { %s1282_s11 = smov %s1117_s22  ;;  %s1283_s12 = smov %s1025_s13 }
 0x651   : > { %s1284_s13 = smov %s1286_s17  ;;  %15 = sbr.rel (!%p13_p3) target bundleno = 4 (0x4), region = 74 }
 0x658   :  { %702 = vsyncpa [#allocation3], 1 }
 0x659   :  { %704 = vsyncpa [#allocation3 + $0x1], 1 }

// kernel: decoder_layer_forward.10
= control target key start
LH: loop header
LB: loop body
LE: loop exit
PB: predicated region body
PF: predicated region fallthrough
CT: control target
= control target key end

     0   :  { %v175_v0 = vmov 0.0   ;;  %vm176_vm0 = vmmov 0   ;;  %vm50_vm1 = vcmask 261120   ;;  %s252_s1 = inlined_call_operand.vmem [shape: bf16[32,32], index: 1, kind: input, shape index: {}]   ;;  %s253_s0 = inlined_call_operand.vmem [shape: f32[16,32], index: 0, kind: input, shape index: {}]   ;;  %s254_s2 = inlined_call_operand.vmem [shape: f32[1,32], index: 2, kind: input, shape index: {}]   ;;  %s255_s3 = inlined_call_operand.vmem [shape: f32[16,32], index: 3, kind: input, shape index: {}]   ;;  %s256_s4 = inlined_call_operand.vmem [shape: f32[1,32], index: 4, kind: input, shape index: {}]   ;;  %s257_s5 = inlined_call_operand.vmem [shape: f32[1,32], index: 5, kind: input, shape index: {}]   ;;  %s258_s6 = inlined_call_operand.vmem [shape: f32[16,32], index: 6, kind: output, shape index: {}]  }
   0x1   :  { %159 = vmatprep.subr.bf16.mxu0 %v175_v0  ;;  %v169_v1 = vld [vmem:[%s252_s1] sm:$0xff]   ;;  %163 = vmatprep.mubr.msk.bf16.mxu0 %vm176_vm0, %v175_v0  ;;  %v170_v2 = vld [vmem:[%s252_s1 + $0x8] sm:$0xff]  }
   0x2   :  { %160 = vmatpush3.bf16.msra.mxu0 %v169_v1  ;;  %v24_v3 = vld [vmem:[%s253_s0] sm:$0xff]  ;;  %v25_v4 = vld [vmem:[%s253_s0 + $0x8] sm:$0xff] }
   0x3   :  { %161 = vmatprep.subr.bf16.mxu0 %v175_v0  ;;  %v26_v5 = vpack.c.bf16 %v25_v4, %v24_v3  ;;  %v150_v6 = vld [vmem:[%s254_s2] ss:$0 sm:$0xff]  ;;  %v96_v12 = vld [vmem:[%s255_s3 + $0x8] sm:$0xff] }
   0x4   :  { %v95_v8 = vld [vmem:[%s255_s3] sm:$0xff] }
   0x5   :  { %v154_v36 = vld [vmem:[%s256_s4] ss:$0 sm:$0xff] }
   0x6   :  { %162 = vmatpush3.bf16.msra.mxu0 %v170_v2  ;;  %v155_v38 = vld [vmem:[%s257_s5] ss:$0 sm:$0xff] }
   0x9   :  { %164 = vmatmul.mubr.msk.bf16.vlgmr.msra.gmra.mrb[0].mxu0 %vm50_vm1, %v26_v5 }
  0xdc   :  { %v88_v7 = vpop.f32.mrb[0].mxu0 }
  0xdd   :  { %v89_v9 = vadd.f32 %v150_v6, %v88_v7  ;;  %v165_v10 = vpop.f32.mrb[1].mxu0 }
  0xde   :  { %v91_v11 = vpop.f32.mrb[2].mxu0 }
  0xdf   :  { %v92_v13 = vadd.f32 %v150_v6, %v91_v11  ;;  %v166_v14 = vpop.f32.mrb[3].mxu0  ;;  %v97_v15 = vadd.f32 %v95_v8, %v89_v9 }
  0xe1   :  { %v101_v16 = vsel %vm50_vm1, %v97_v15, 0.0  ;;  %v98_v17 = vadd.f32 %v96_v12, %v92_v13 }
  0xe2   :  { %102 = vadd.xlane.f32.xlu0 %v101_v16 }
  0xe3   :  { %v104_v18 = vsel %vm50_vm1, %v98_v17, 0.0 }
  0xe6   :  { %105 = vadd.xlane.f32.xlu0 %v104_v18 }
 0x16f   :  { %v103_v19 = vpop.xlane.xlu0 %102 }
 0x170   :  { %v108_v20 = vmul.f32 0.03125, %v103_v19 }
 0x172   :  { %v110_v21 = vsub.f32 %v97_v15, %v108_v20 }
 0x173   :  { %v106_v22 = vpop.xlane.xlu0 %105 }
 0x174   :  { %v109_v23 = vmul.f32 0.03125, %v106_v22  ;;  %v112_v24 = vmul.f32 %v110_v21, %v110_v21 }
 0x176   :  { %v111_v25 = vsub.f32 %v98_v17, %v109_v23  ;;  %v114_v26 = vsel %vm50_vm1, %v112_v24, 0.0 }
 0x177   :  { %115 = vadd.xlane.f32.xlu1 %v114_v26 }
 0x178   :  { %v113_v27 = vmul.f32 %v111_v25, %v111_v25 }
 0x17a   :  { %v117_v28 = vsel %vm50_vm1, %v113_v27, 0.0 }
 0x17b   :  { %118 = vadd.xlane.f32.xlu1 %v117_v28 }
 0x204   :  { %v116_v29 = vpop.xlane.xlu1 %115 }
 0x205   :  { %v120_v30 = vmul.f32 0.03125, %v116_v29 }
 0x207   :  { %v122_v31 = vadd.f32 1e-06, %v120_v30 }
 0x208   :  { %v119_v32 = vpop.xlane.xlu1 %118 }
 0x209   :  { %171 = vrsqrt.f32 %v122_v31  ;;  %v121_v33 = vmul.f32 0.03125, %v119_v32 }
 0x20b   :  { %v123_v34 = vadd.f32 1e-06, %v121_v33 }
 0x20d   :  { %173 = vrsqrt.f32 %v123_v34 }
 0x213   :  { %v172_v35 = vpop.eup %171 }
 0x214   :  { %v126_v37 = vmul.f32 %v172_v35, %v110_v21 }
 0x216   :  { %v134_v39 = vmul.f32 %v154_v36, %v126_v37 }
 0x217   :  { %v174_v40 = vpop.eup %173 }
 0x218   :  { %v142_v41 = vadd.f32 %v155_v38, %v134_v39  ;;  %v127_v42 = vmul.f32 %v174_v40, %v111_v25 }
 0x21a   :  { %144 = vst.msk [vmem:[%s258_s6] sm:$0xff] %vm50_vm1, %v142_v41  ;;  %v135_v43 = vmul.f32 %v154_v36, %v127_v42 }
 0x21c   :  { %v143_v44 = vadd.f32 %v155_v38, %v135_v43 }
 0x21e   :  { %145 = vst.msk [vmem:[%s258_s6 + $0x8] sm:$0xff] %vm50_vm1, %v143_v44 }

// kernel: decoder_layer_forward.12
= control target key start
LH: loop header
LB: loop body
LE: loop exit
PB: predicated region body
PF: predicated region fallthrough
CT: control target
= control target key end

     0   :  { %v112_v0 = vmov 0.0   ;;  %vm113_vm0 = vmmov 0   ;;  %vm41_vm1 = vcmask 261120   ;;  %vm86_vm2 = vcmask 523264   ;;  %s155_s1 = inlined_call_operand.vmem [shape: bf16[32,64], index: 1, kind: input, shape index: {}]   ;;  %s156_s0 = inlined_call_operand.vmem [shape: f32[16,32], index: 0, kind: input, shape index: {}]   ;;  %s157_s2 = inlined_call_operand.vmem [shape: f32[1,64], index: 2, kind: input, shape index: {}]   ;;  %s158_s3 = inlined_call_operand.vmem [shape: f32[16,64], index: 3, kind: output, shape index: {}]  }
   0x1   :  { %100 = vmatprep.subr.bf16.mxu0 %v112_v0  ;;  %v110_v1 = vld [vmem:[%s155_s1] sm:$0xff]   ;;  %104 = vmatprep.mubr.msk.bf16.mxu0 %vm113_vm0, %v112_v0  ;;  %v111_v2 = vld [vmem:[%s155_s1 + $0x8] sm:$0xff]  }
   0x2   :  { %101 = vmatpush3.bf16.msra.mxu0 %v110_v1  ;;  %v15_v3 = vld [vmem:[%s156_s0] sm:$0xff]  ;;  %v16_v4 = vld [vmem:[%s156_s0 + $0x8] sm:$0xff] }
   0x3   :  { %102 = vmatprep.subr.bf16.mxu0 %v112_v0  ;;  %v17_v5 = vpack.c.bf16 %v16_v4, %v15_v3  ;;  %v93_v6 = vld [vmem:[%s157_s2] ss:$0 sm:$0xff] }
   0x6   :  { %103 = vmatpush3.bf16.msra.mxu0 %v111_v2 }
   0x9   :  { %105 = vmatmul.mubr.msk.bf16.vlgmr.msra.gmra.mrb[0].mxu0 %vm41_vm1, %v17_v5 }
  0xdc   :  { %v79_v7 = vpop.f32.mrb[0].mxu0 }
  0xdd   :  { %v80_v8 = vadd.f32 %v93_v6, %v79_v7  ;;  %v106_v9 = vpop.f32.mrb[1].mxu0 }
  0xde   :  { %v82_v10 = vpop.f32.mrb[2].mxu0 }
  0xdf   :  { %87 = vst.msk [vmem:[%s158_s3] sm:$0xff] %vm86_vm2, %v80_v8  ;;  %v83_v11 = vadd.f32 %v93_v6, %v82_v10  ;;  %v107_v12 = vpop.f32.mrb[3].mxu0 }
  0xe1   :  { %88 = vst.msk [vmem:[%s158_s3 + $0x8] sm:$0xff] %vm86_vm2, %v83_v11 }

// kernel: decoder_layer_forward.13
= control target key start
LH: loop header
LB: loop body
LE: loop exit
PB: predicated region body
PF: predicated region fallthrough
CT: control target
= control target key end

     0   :  { %9 = vsyncpa [#allocation3], 0  ;;  %s1341_s0 = inlined_call_operand.vmem [shape: f32[2,8,32], index: 0, kind: input, shape index: {}]   ;;  %s1342_s1 = inlined_call_operand.vmem [shape: f32[2,8,64], index: 1, kind: input, shape index: {}]   ;;  %s1343_s2 = inlined_call_operand.vmem [shape: f32[2,8,32], index: 2, kind: output, shape index: {0}]   ;;  %s1344_s3 = inlined_call_operand.hbm [shape: f32[2,4,8,8], index: 3, kind: output, shape index: {1}]  }
   0x1   :  { %11 = vsyncpa [#allocation3 + $0x1], 0  ;;  %s1133_s12 = smov 0   ;;  %s1135_s13 = smov 0  }
   0x2   :  { %s1137_s14 = smov 0   ;;  %s1139_s15 = smov 0  }
   0x3   :  { %s1141_s16 = smov 0   ;;  %s1143_s17 = smov 0  }
   0x4 LB: > { %s845_s18 = sadd.s32 4294967295, %s1097_s17   ;;  %s846_s19 = sadd.s32 4294967294, %s1097_s17   ;;  %s1097_s17 = sphi %s1143_s17, %s17_s17   ;;  %s1093_s16 = sphi %s1141_s16, %s1351_s16   ;;  %s1089_s15 = sphi %s1139_s15, %s1350_s15   ;;  %s1085_s14 = sphi %s1137_s14, %s1349_s14   ;;  %s1081_s13 = sphi %s1135_s13, %s1348_s13   ;;  %s1077_s12 = sphi %s1133_s12, %s1347_s12  }
   0x5   : > { %s29_s20 = sadd.s32 1, %s1093_s16  ;;  %s120_s21 = sadd.s32 1, %s1085_s14 }
   0x6   : > { %p31_p0 = scmp.ge.s32.totalorder %s29_s20, 2  ;;  %p130_p1 = scmp.ne.s32.totalorder %s1085_s14, %s1081_s13 }
   0x7   : > { %p131_p2 = scmp.eq.s32.totalorder %s845_s18, 1  ;;  %p136_p3 = scmp.ne.s32.totalorder %s1081_s13, %s1077_s12 }
   0x8   : > { %s1353_s20 = smov (%p31_p0, %s29_s20), 0  ;;  %p137_p5 = scmp.eq.s32.totalorder %s846_s19, 1 }
   0x9   : > { %p1173_p4 = por %p131_p2, %p130_p1  ;;  %s115_s23 = ssub.s32 %s1093_s16, %s1353_s20 }
   0xa   : > { %p849_p6 = scmp.ge.s32.totalorder %s1097_s17, 1  ;;  %p118_p7 = scmp.eq.s32.totalorder %s115_s23, 0 }
   0xb   : > { %p1180_p8 = por %p137_p5, %p136_p3  ;;  %p172_p9 = scmp.lt.s32.totalorder %s1097_s17, 3 }
   0xc   : > { %s1186_s25 = scalar_select %p118_p7, %s1085_s14, %s120_s21  }
   0xd   : > { %p173_p10 = pnand %p849_p6, %p172_p9 }
   0xe   : > { %p209_p11 = scmp.lt.s32.totalorder (!%p173_p10), %s1089_s15, 1  ;;  %v1099_v0 = vmov (!%p173_p10), 0.0   ;;  %vm1100_vm0 = vmmov (!%p173_p10), 0   ;;  %vm232_vm1 = vcmask (!%p173_p10), 64512   ;;  %s1101_s7 = smov (!%p173_p10), 96   ;;  %vm299_vm2 = vcmask (!%p173_p10), 1043456  }
   0xf   : > { %176 = sbr.rel (%p173_p10) target bundleno = 1453 (0x5ad), region = 28  ;;  %887 = vmatprep.subr.bf16.mxu0 (!%p173_p10), %v1099_v0  ;;  %889 = vmatprep.mubr.msk.bf16.mxu0 (!%p173_p10), %vm1100_vm0, %v1099_v0  ;;  %s1102_s8 = smov (!%p173_p10), 120  }
  0x10   : > { %893 = vmatprep.subr.bf16.mxu1 (!%p173_p10), %v1099_v0  ;;  %895 = vmatprep.mubr.msk.bf16.mxu1 (!%p173_p10), %vm1100_vm0, %v1099_v0  ;;  %s1103_s9 = smov (!%p173_p10), 112   ;;  %s1104_s10 = smov (!%p173_p10), 104  }
  0x11   : > { %s206_s11 = sand.u32 (!%p173_p10), 1, %s1081_s13   ;;  %s1106_s28 = smov (!%p173_p10), 72  }
  0x12   : > { %s850_s18 = sshll.u32 (!%p173_p10), %s206_s11, 5  ;;  %s1107_s29 = smov (!%p173_p10), 80  }
  0x13   : > { %s1226_s19 = scalar_lea.vmem (!%p173_p10), [#allocation2], %s850_s18  ;;  %s870_s4 = sshll.u32 (!%p173_p10), %s1089_s15, 9 }
  0x14   : > { %s727_s5 = sshll.u32 (!%p173_p10), %s1226_s19, 4  ;;  %s1287_s5 = int_to_ptr.vmem [resolvable:$true] %s727_s5 }
  0x16   : > { %s210_s26 = scalar_select %p209_p11, %s1089_s15, 1 }
  0x17   : > { %s1109_s15 = smov [#allocation2]  }
  0x18   : > { %s1196_s27 = sshll.u32 %s210_s26, 3  ;;  %s1023_s18 = sshll.u32 %s1109_s15, 4  ;;  %s1024_s18 = int_to_ptr.vmem [resolvable:$false] %s1023_s18 }
  0x19   : > { %s219_s30 = scalar_lea.vmem %s1342_s1, %s1196_s27  ;;  %s215_s6 = scalar_lea.vmem %s1341_s0, %s1196_s27 }
  0x1a   : > { %v228_v1 = vld [vmem:[%s219_s30] sm:$0xff]  ;;  %s1248_s26 = scalar_lea.vmem %s1343_s2, %s1196_s27  ;;  %s1105_s27 = smov 88  }
  0x1b   : > { %v1202_v2 = vpack.c.bf16 %v228_v1, %v228_v1  ;;  %v229_v4 = vld [vmem:[%s215_s6] sm:$0xff]  ;;  %s1108_s30 = smov 8   ;;  %p1026_p1 = scmp.lt.s32.totalorder %s1287_s5, %s1024_s18 }
  0x1c   : > { %v230_v5 = vpack.c.bf16 %v229_v4, %v229_v4 }
  0x1d   : > { %v237_v3 = vsel %vm232_vm1, %v1202_v2, 0  ;;  %294 = vrot.lane.b32.xlu1 %v1202_v2, %s1101_s7 }
  0x1e   : > { %888 = vmatpush3.bf16.xpose.msra.mxu0 %v237_v3 }
  0x1f   : > { %905 = vmatprep.subr.bf16.mxu0 %v1099_v0 }
  0x21   : > { %347 = vrot.lane.b32.xlu1 %v1202_v2, %s1102_s8 }
  0x25   : > { %890 = vmatmul.mubr.msk.bf16.vlgmr.msra.gmra.mrb[0].mxu0 %vm232_vm1, %v230_v5  ;;  %466 = vrot.lane.b32.xlu1 %v1202_v2, %s1103_s9 }
  0x26   : > { %907 = vmatprep.mubr.msk.bf16.mxu0 %vm1100_vm0, %v1099_v0 }
  0x29   : > { %464 = vrot.lane.b32.xlu1 %v230_v5, %s1103_s9  ;;  %s1291_s9 = scalar_lea.sflag [#allocation3], %s206_s11 }
  0x2d   : > { %585 = vrot.lane.b32.xlu1 %v1202_v2, %s1104_s10 }
  0x31   : > { %583 = vrot.lane.b32.xlu1 %v230_v5, %s1104_s10  ;;  %s1019_s10 = scalar_lea.vmem %s1287_s5, 512 }
  0x32   : > { %p1020_p12 = scmp.ne.s32.totalorder %s1287_s5, %s1019_s10 }
  0x34   : > { %p1021_p13 = pnand %p1020_p12, %p1173_p4 }
  0x36   : > { %p1022_p0 = pneg %p1021_p13 }
  0x8f   : > { %v295_v17 = vpop.permute.xlu1 %294 }
  0x90   : > { %v301_v18 = vsel %vm299_vm2, %v295_v17, 0 }
  0x91   : > { %894 = vmatpush3.bf16.msra.mxu1 %v301_v18 }
  0x92   : > { %899 = vmatprep.subr.bf16.mxu1 %v1099_v0 }
  0x93   : > { %v348_v21 = vpop.permute.xlu1 %347 }
  0x94   : > { %v353_v23 = vsel %vm232_vm1, %v348_v21, 0 }
  0x97   : > { %v467_v25 = vpop.permute.xlu1 %466 }
  0x98   : > { %v472_v28 = vsel %vm232_vm1, %v467_v25, 0 }
  0x9b   : > { %v465_v27 = vpop.permute.xlu1 %464 }
  0x9f   : > { %v586_v29 = vpop.permute.xlu1 %585 }
  0xa0   : > { %v591_v30 = vsel %vm232_vm1, %v586_v29, 0 }
  0xa3   : > { %v584_v31 = vpop.permute.xlu1 %583 }
  0xf8   : > { %v273_v6 = vpop.f32.mrb[0].mxu0 }
  0xf9   : > { %v279_v7 = vmul.f32 0.35355338, %v273_v6  ;;  %v891_v8 = vpop.f32.mrb[1].mxu0 }
  0xfa   : > { %v276_v9 = vpop.f32.mrb[2].mxu0 }
  0xfb   : > { %v892_v10 = vpop.f32.mrb[3].mxu0  ;;  %v280_v11 = vsel %vm232_vm1, %v279_v7, -inf }
  0xfc   : > { %281 = vmax.xlane.f32.xlu0 %v280_v11 }
 0x189   : > { %v282_v12 = vpop.xlane.xlu0 %281 }
 0x18a   : > { %v283_v13 = vsub.f32 %v279_v7, %v282_v12 }
 0x18c   : > { %v284_v14 = vmul.f32 1.442695, %v283_v13 }
 0x18e   : > { %1003 = vpow2.f32 %v284_v14 }
 0x198   : > { %v1004_v15 = vpop.eup %1003 }
 0x199   : > { %v286_v16 = vsel %vm232_vm1, %v1004_v15, 0.0 }
 0x19a   : > { %287 = vadd.xlane.f32.xlu0 %v286_v16 }
 0x1b0   : > { %345 = vrot.lane.b32.xlu0 %v230_v5, %s1102_s8  ;;  %s1285_s8 = scalar_lea.hbm %s1344_s3, %s870_s4 }
 0x227   : > { %v288_v19 = vpop.xlane.xlu0 %287 }
 0x228   : > { %1005 = vrcp.f32 %v288_v19 }
 0x22b   : > { %v346_v26 = vpop.permute.xlu0 %345 }
 0x232   : > { %v1006_v20 = vpop.eup %1005 }
 0x233   : > { %v290_v22 = vmul.f32 %v1006_v20, %v1004_v15 }
 0x235   : > { %291 = vst.msk [vmem:[%s1226_s19] sm:$0xff] %vm232_vm1, %v290_v22  ;;  %v292_v24 = vpack.c.bf16 %v290_v22, %v290_v22 }
 0x237   : > { %896 = vmatmul.mubr.msk.bf16.vlgmr.msra.gmra.mrb[0].mxu1 %vm232_vm1, %v292_v24 }
 0x238   : > { %900 = vmatpush3.bf16.xpose.msra.mxu1 %v353_v23  ;;  %901 = vmatprep.mubr.msk.bf16.mxu1 %vm1100_vm0, %v1099_v0 }
 0x239   : > { %911 = vmatprep.subr.bf16.mxu1 %v1099_v0 }
 0x23f   : > { %902 = vmatmul.mubr.msk.bf16.vlgmr.msra.gmra.mrb[4].mxu1 %vm232_vm1, %v346_v26 }
 0x240   : > { %912 = vmatpush3.bf16.xpose.msra.mxu1 %v472_v28  ;;  %913 = vmatprep.mubr.msk.bf16.mxu1 %vm1100_vm0, %v1099_v0 }
 0x241   : > { %923 = vmatprep.subr.bf16.mxu1 %v1099_v0 }
 0x247   : > { %914 = vmatmul.mubr.msk.bf16.vlgmr.msra.gmra.mrb[8].mxu1 %vm232_vm1, %v465_v27 }
 0x248   : > { %924 = vmatpush3.bf16.xpose.msra.mxu1 %v591_v30  ;;  %925 = vmatprep.mubr.msk.bf16.mxu1 %vm1100_vm0, %v1099_v0 }
 0x24f   : > { %926 = vmatmul.mubr.msk.bf16.vlgmr.msra.gmra.mrb[12].mxu1 %vm232_vm1, %v584_v31 }
 0x30a   : > { %v337_v32 = vpop.f32.mrb[0].mxu1 }
 0x30b   : > { %343 = vst.msk [vmem:[%s1248_s26] sm:$0xff] %vm232_vm1, %v337_v32  ;;  %v897_v33 = vpop.f32.mrb[1].mxu1 }
 0x30c   : > { %v340_v34 = vpop.f32.mrb[2].mxu1 }
 0x30d   : > { %v898_v35 = vpop.f32.mrb[3].mxu1 }
 0x312   : > { %v389_v36 = vpop.f32.mrb[4].mxu1 }
 0x313   : > { %v395_v37 = vmul.f32 0.35355338, %v389_v36  ;;  %v903_v38 = vpop.f32.mrb[5].mxu1 }
 0x314   : > { %v392_v39 = vpop.f32.mrb[6].mxu1 }
 0x315   : > { %v904_v40 = vpop.f32.mrb[7].mxu1  ;;  %v396_v41 = vsel %vm232_vm1, %v395_v37, -inf }
 0x316   : > { %397 = vmax.xlane.f32.xlu1 %v396_v41 }
 0x31a   : > { %v508_v42 = vpop.f32.mrb[8].mxu1 }
 0x31b   : > { %v514_v43 = vmul.f32 0.35355338, %v508_v42  ;;  %v915_v44 = vpop.f32.mrb[9].mxu1 }
 0x31c   : > { %v511_v45 = vpop.f32.mrb[10].mxu1 }
 0x31d   : > { %v916_v46 = vpop.f32.mrb[11].mxu1  ;;  %v515_v47 = vsel %vm232_vm1, %v514_v43, -inf }
 0x31e   : > { %516 = vmax.xlane.f32.xlu0 %v515_v47 }
 0x322   : > { %v627_v48 = vpop.f32.mrb[12].mxu1 }
 0x323   : > { %v633_v49 = vmul.f32 0.35355338, %v627_v48  ;;  %v927_v50 = vpop.f32.mrb[13].mxu1 }
 0x324   : > { %v630_v51 = vpop.f32.mrb[14].mxu1 }
 0x325   : > { %v928_v52 = vpop.f32.mrb[15].mxu1  ;;  %v634_v53 = vsel %vm232_vm1, %v633_v49, -inf }
 0x326   : > { %635 = vmax.xlane.f32.xlu1 %v634_v53 }
 0x337   : > { %410 = vrot.lane.b32.xlu1 %v1202_v2, %s1105_s27 }
 0x3a3   : > { %v398_v54 = vpop.xlane.xlu1 %397 }
 0x3a4   : > { %v399_v55 = vsub.f32 %v395_v37, %v398_v54 }
 0x3a6   : > { %v400_v56 = vmul.f32 1.442695, %v399_v55 }
 0x3a8   : > { %1007 = vpow2.f32 %v400_v56 }
 0x3ab   : > { %v517_v57 = vpop.xlane.xlu0 %516 }
 0x3ac   : > { %v518_v58 = vsub.f32 %v514_v43, %v517_v57 }
 0x3ae   : > { %v519_v59 = vmul.f32 1.442695, %v518_v58 }
 0x3b0   : > { %1009 = vpow2.f32 %v519_v59 }
 0x3b2   : > { %v1008_v60 = vpop.eup %1007 }
 0x3b3   : > { %v636_v61 = vpop.xlane.xlu1 %635  ;;  %v402_v62 = vsel %vm232_vm1, %v1008_v60, 0.0 }
 0x3b4   : > { %v637_v63 = vsub.f32 %v633_v49, %v636_v61  ;;  %403 = vadd.xlane.f32.xlu0 %v402_v62 }
 0x3b6   : > { %v638_v1 = vmul.f32 1.442695, %v637_v63 }
 0x3b7   : > { %v411_v3 = vpop.permute.xlu1 %410 }
 0x3b8   : > { %1011 = vpow2.f32 %v638_v1  ;;  %v416_v4 = vsel %vm299_vm2, %v411_v3, 0 }
 0x3b9   : > { %906 = vmatpush3.bf16.msra.mxu0 %v416_v4 }
 0x3ba   : > { %v1010_v5 = vpop.eup %1009  ;;  %917 = vmatprep.subr.bf16.mxu0 %v1099_v0 }
 0x3bb   : > { %v521_v6 = vsel %vm232_vm1, %v1010_v5, 0.0 }
 0x3bc   : > { %522 = vadd.xlane.f32.xlu1 %v521_v6 }
 0x3c2   : > { %v1012_v7 = vpop.eup %1011 }
 0x3c3   : > { %v640_v8 = vsel %vm232_vm1, %v1012_v7, 0.0 }
 0x3c4   : > { %641 = vadd.xlane.f32.xlu0 %v640_v8 }
 0x3cd   : > { %648 = vrot.lane.b32.xlu1 %v1202_v2, %s1106_s28 }
 0x3da   : > { %529 = vrot.lane.b32.xlu0 %v1202_v2, %s1107_s29 }
 0x441   : > { %v404_v9 = vpop.xlane.xlu0 %403 }
 0x442   : > { %1013 = vrcp.f32 %v404_v9 }
 0x449   : > { %v523_v10 = vpop.xlane.xlu1 %522 }
 0x44a   : > { %1015 = vrcp.f32 %v523_v10 }
 0x44c   : > { %v1014_v11 = vpop.eup %1013 }
 0x44d   : > { %v406_v12 = vmul.f32 %v1014_v11, %v1008_v60  ;;  %v649_v17 = vpop.permute.xlu1 %648 }
 0x44e   : > { %v654_v20 = vsel %vm299_vm2, %v649_v17, 0 }
 0x44f   : > { %857 = vst.msk [vmem:[%s1226_s19 + $0x8] sm:$0xff] %vm232_vm1, %v406_v12  ;;  %v409_v13 = vpack.c.bf16 %v406_v12, %v406_v12 }
 0x451   : > { %v642_v14 = vpop.xlane.xlu0 %641  ;;  %908 = vmatmul.mubr.msk.bf16.vlgmr.msra.gmra.mrb[4].mxu0 %vm232_vm1, %v409_v13 }
 0x452   : > { %1017 = vrcp.f32 %v642_v14  ;;  %919 = vmatprep.mubr.msk.bf16.mxu0 %vm1100_vm0, %v1099_v0 }
 0x454   : > { %v1016_v15 = vpop.eup %1015 }
 0x455   : > { %v525_v2 = vmul.f32 %v1016_v15, %v1010_v5  ;;  %v530_v16 = vpop.permute.xlu0 %529 }
 0x456   : > { %v535_v18 = vsel %vm299_vm2, %v530_v16, 0 }
 0x457   : > { %860 = vst.msk [vmem:[%s1226_s19 + $0x10] sm:$0xff] %vm232_vm1, %v525_v2  ;;  %918 = vmatpush3.bf16.msra.mxu0 %v535_v18  ;;  %v528_v19 = vpack.c.bf16 %v525_v2, %v525_v2 }
 0x458   : > { %929 = vmatprep.subr.bf16.mxu0 %v1099_v0 }
 0x45a   : > { %920 = vmatmul.mubr.msk.bf16.vlgmr.msra.gmra.mrb[8].mxu0 %vm232_vm1, %v528_v19 }
 0x45b   : > { %930 = vmatpush3.bf16.msra.mxu0 %v654_v20  ;;  %931 = vmatprep.mubr.msk.bf16.mxu0 %vm1100_vm0, %v1099_v0 }
 0x45c   : > { %v1018_v21 = vpop.eup %1017 }
 0x45d   : > { %v644_v22 = vmul.f32 %v1018_v21, %v1012_v7 }
 0x45f   : > { %863 = vst.msk [vmem:[%s1226_s19 + $0x18] sm:$0xff] %vm232_vm1, %v644_v22  ;;  %v647_v23 = vpack.c.bf16 %v644_v22, %v644_v22  ;;  %s1025_s19 = scalar_lea.vmem %s1024_s18, 1024 }
 0x460   : > { %p1027_p2 = scmp.lt.s32.totalorder %s1025_s19, %s1019_s10 }
 0x462   : > { %932 = vmatmul.mubr.msk.bf16.vlgmr.msra.gmra.mrb[12].mxu0 %vm232_vm1, %v647_v23  ;;  %p1028_p3 = por %p1027_p2, %p1026_p1 }
 0x464   : > { %p1029_p5 = pnand %p1028_p3, %p1022_p0 }
 0x524   : > { %v452_v24 = vpop.f32.mrb[4].mxu0 }
 0x525   : > { %459 = vrot.lane.b32.xlu1 %v452_v24, %s1108_s30  ;;  %v909_v25 = vpop.f32.mrb[5].mxu0 }
 0x526   : > { %v455_v26 = vpop.f32.mrb[6].mxu0 }
 0x527   : > { %v910_v27 = vpop.f32.mrb[7].mxu0 }
 0x528   : > { %1032 = shalt.err (!%p1029_p5)
}
 0x529   : > { %s1033_s11 = scalar_lea.hbm %s1285_s8, 512  ;;  %s1037_s27 = scalar_lea.hbm %s1344_s3, 1024 }
 0x52a   : > { %p1034_p6 = scmp.ne.s32.totalorder %s1285_s8, %s1033_s11  ;;  %p1038_p10 = scmp.lt.u32.totalorder %s1285_s8, %s1344_s3 }
 0x52b   : > { %p1039_p11 = scmp.lt.u32.totalorder %s1037_s27, %s1033_s11  ;;  %p1041_p13 = scmp.lt.u32.totalorder %s1033_s11, %s1285_s8 }
 0x52c   : > { %p1035_p7 = pnand %p1034_p6, %p1173_p4 }
 0x52d   : > { %p1040_p12 = por %p1039_p11, %p1038_p10 }
 0x52e   : > { %p1036_p9 = pneg %p1035_p7 }
 0x52f   : > { %p1042_p0 = por %p1041_p13, %p1040_p12 }
 0x531   : > { %p1043_p1 = pnand %p1042_p0, %p1036_p9 }
 0x533   : > { %1046 = shalt.err (!%p1043_p1)
}
 0x534   : > { %s1110_s4 = smov 128   ;;  %v571_v0 = vpop.f32.mrb[8].mxu0  ;;  %s1111_s6 = smov 16   ;;  %vm462_vm3 = vcmask 130112   ;;  %vm581_vm4 = vcmask 195712   ;;  %vm700_vm5 = vcmask 261312  }
 0x535   : > { %935 = dma.vmem_to_hbm [thread:$0]  (%p1173_p4), %s1287_s5, 512, %s1285_s8, %s1291_s9, %s1110_s4, %s1110_s4, %s1108_s30   ;;  %v921_v28 = vpop.f32.mrb[9].mxu0 }
 0x536   : > { %578 = vrot.lane.b32.xlu0 %v571_v0, %s1111_s6  ;;  %v574_v29 = vpop.f32.mrb[10].mxu0  ;;  %s1112_s7 = smov 24  }
 0x537   : > { %v922_v30 = vpop.f32.mrb[11].mxu0 }
 0x538   : > { %v690_v31 = vpop.f32.mrb[12].mxu0 }
 0x539   : > { %697 = vrot.lane.b32.xlu1 %v690_v31, %s1112_s7  ;;  %v933_v32 = vpop.f32.mrb[13].mxu0 }
 0x53a   : > { %v693_v33 = vpop.f32.mrb[14].mxu0 }
 0x53b   : > { %v934_v34 = vpop.f32.mrb[15].mxu0 }
 0x597   : > { %v460_v35 = vpop.permute.xlu1 %459 }
 0x598   : > { %463 = vst.msk [vmem:[%s1248_s26] sm:$0xff] %vm462_vm3, %v460_v35 }
 0x5a8   : > { %v579_v36 = vpop.permute.xlu0 %578 }
 0x5a9   : > { %582 = vst.msk [vmem:[%s1248_s26] sm:$0xff] %vm581_vm4, %v579_v36 }
 0x5ab   : > { %v698_v37 = vpop.permute.xlu1 %697 }
 0x5ac   : > { %701 = vst.msk [vmem:[%s1248_s26] sm:$0xff] %vm700_vm5, %v698_v37 }
 0x5ad PF: > { %p941_p4 = scmp.ge.s32.totalorder %s1097_s17, 2  ;;  %s752_s22 = sand.u32 1, %s1077_s12  }
 0x5ae   : > { %s753_s30 = scalar_lea.sflag [#allocation3], %s752_s22 }
 0x5af   : > { %p938_p2 = pnand %p941_p4, %p1180_p8 }
 0x5b1   : > { %1072 = dma.done.wait (!%p938_p2), %s753_s30, 512  }
 0x5b2   : > { %1074 = vsyncadd (!%p938_p2), %s753_s30, 4294966784  ;;  %s17_s17 = sadd.s32 1, %s1097_s17   ;;  %s1347_s12 = smov %s1081_s13 }
 0x5b3   : > { %p14_p3 = scmp.ge.s32.totalorder %s17_s17, 4   ;;  %s1348_s13 = smov %s1085_s14 }
 0x5b4   : > { %s1349_s14 = smov %s1186_s25  ;;  %s1350_s15 = smov %s1093_s16 }
 0x5b5   : > { %s1351_s16 = smov %s1353_s20  ;;  %16 = sbr.rel (!%p14_p3) target bundleno = 4 (0x4), region = 81 }
 0x5bc   :  { %758 = vsyncpa [#allocation3], 1 }
 0x5bd   :  { %760 = vsyncpa [#allocation3 + $0x1], 1 }

// kernel: decoder_layer_forward.15
= control target key start
LH: loop header
LB: loop body
LE: loop exit
PB: predicated region body
PF: predicated region fallthrough
CT: control target
= control target key end

     0   :  { %v350_v1 = vmov 0.0   ;;  %vm351_vm0 = vmmov 0   ;;  %vm32_vm1 = vcmask 261120   ;;  %s454_s0 = inlined_call_operand.vmem [shape: f32[16,32], index: 0, kind: input, shape index: {}]   ;;  %s455_s1 = inlined_call_operand.vmem [shape: bf16[32,64], index: 1, kind: input, shape index: {}]   ;;  %s456_s2 = inlined_call_operand.vmem [shape: f32[1,64], index: 2, kind: input, shape index: {}]   ;;  %s457_s3 = inlined_call_operand.vmem [shape: bf16[64,32], index: 3, kind: input, shape index: {}]   ;;  %s458_s4 = inlined_call_operand.vmem [shape: f32[1,32], index: 4, kind: input, shape index: {}]   ;;  %s459_s5 = inlined_call_operand.vmem [shape: f32[1,32], index: 5, kind: input, shape index: {}]   ;;  %s460_s6 = inlined_call_operand.vmem [shape: f32[1,32], index: 6, kind: input, shape index: {}]   ;;  %s461_s7 = inlined_call_operand.hbm [shape: f32[16,32], index: 7, kind: output, shape index: {}]  }
   0x1   :  { %v316_v0 = vld [vmem:[%s455_s1] sm:$0xff]   ;;  %291 = vmatprep.subr.bf16.mxu0 %v350_v1  ;;  %v317_v2 = vld [vmem:[%s455_s1 + $0x8] sm:$0xff]   ;;  %299 = vmatprep.subr.bf16.mxu1 %v350_v1  ;;  %33 = vst.msk [vmem:[#allocation2] sm:$0xff] %vm32_vm1, %v350_v1  ;;  %34 = vst.msk [vmem:[#allocation2 + $0x8] sm:$0xff] %vm32_vm1, %v350_v1 }
   0x2   :  { %292 = vmatpush3.bf16.msra.mxu0 %v316_v0  ;;  %295 = vmatprep.mubr.msk.bf16.mxu0 %vm351_vm0, %v350_v1  ;;  %v35_v3 = vld [vmem:[%s454_s0] sm:$0xff]  ;;  %v36_v4 = vld [vmem:[%s454_s0 + $0x8] sm:$0xff] }
   0x3   :  { %293 = vmatprep.subr.bf16.mxu0 %v350_v1  ;;  %v318_v5 = vld [vmem:[%s457_s3] sm:$0xff]   ;;  %307 = vmatprep.mubr.msk.bf16.mxu1 %vm351_vm0, %v350_v1  ;;  %v319_v6 = vld [vmem:[%s457_s3 + $0x8] sm:$0xff]   ;;  %v37_v7 = vpack.c.bf16 %v36_v4, %v35_v3 }
   0x4   :  { %300 = vmatpush3.bf16.msra.mxu1 %v318_v5 }
   0x5   :  { %301 = vmatprep.subr.bf16.mxu1 %v350_v1 }
   0x6   :  { %294 = vmatpush3.bf16.msra.mxu0 %v317_v2 }
   0x7   :  { %12 = vsyncpa [#allocation4], 0  ;;  %v320_v8 = vld [vmem:[%s457_s3 + $0x10] sm:$0xff]   ;;  %v321_v9 = vld [vmem:[%s457_s3 + $0x18] sm:$0xff]   ;;  %vm143_vm2 = vcmask 523264   ;;  %s352_s20 = smov [#allocation3]  }
   0x8   :  { %302 = vmatpush3.bf16.msra.mxu1 %v319_v6  ;;  %v271_v10 = vld [vmem:[%s456_s2] ss:$0 sm:$0xff]  ;;  %v110_v22 = vld [vmem:[#allocation2 + $0x8] sm:$0xff]  ;;  %s260_s21 = sshll.u32 %s352_s20, 4  ;;  %s261_s21 = int_to_ptr.vmem [resolvable:$true] %s260_s21 }
   0x9   :  { %296 = vmatmul.mubr.msk.bf16.vlgmr.msra.gmra.mrb[0].mxu0 %vm32_vm1, %v37_v7  ;;  %303 = vmatprep.subr.bf16.mxu1 %v350_v1  ;;  %v109_v20 = vld [vmem:[#allocation2] sm:$0xff]  ;;  %s326_s22 = scalar_lea.vmem %s261_s21, 256  ;;  %p331_p1 = scmp.lt.s32.totalorder %s261_s21, %s261_s21 }
   0xa   :  { %v280_v28 = vld [vmem:[%s458_s4] ss:$0 sm:$0xff]  ;;  %p327_p0 = scmp.ne.s32.totalorder %s261_s21, %s326_s22  ;;  %p332_p2 = scmp.lt.s32.totalorder %s326_s22, %s326_s22 }
   0xb   :  { %v281_v54 = vld [vmem:[%s459_s5] ss:$0 sm:$0xff] }
   0xc   :  { %304 = vmatpush3.bf16.msra.mxu1 %v320_v8  ;;  %v282_v56 = vld [vmem:[%s460_s6] ss:$0 sm:$0xff]  ;;  %p333_p3 = por %p332_p2, %p331_p1 }
   0xd   :  { %305 = vmatprep.subr.bf16.mxu1 %v350_v1 }
   0xe   :  { %p334_p4 = pnand %p333_p3, %p327_p0 }
  0x10   :  { %306 = vmatpush3.bf16.msra.mxu1 %v321_v9 }
  0xdc   :  { %v99_v11 = vpop.f32.mrb[0].mxu0 }
  0xdd   :  { %v100_v12 = vadd.f32 %v271_v10, %v99_v11  ;;  %v297_v13 = vpop.f32.mrb[1].mxu0 }
  0xde   :  { %v102_v14 = vpop.f32.mrb[2].mxu0 }
  0xdf   :  { %v103_v15 = vadd.f32 %v271_v10, %v102_v14  ;;  %v298_v16 = vpop.f32.mrb[3].mxu0  ;;  %v106_v17 = vmax.f32 %v100_v12, 0.0 }
  0xe1   :  { %v107_v18 = vmax.f32 %v103_v15, 0.0 }
  0xe3   :  { %v108_v19 = vpack.c.bf16 %v107_v18, %v106_v17 }
  0xe5   :  { %308 = vmatmul.mubr.msk.bf16.vlgmr.msra.gmra.mrb[0].mxu1 %vm143_vm2, %v108_v19 }
 0x1b8   :  { %v181_v21 = vpop.f32.mrb[0].mxu1 }
 0x1b9   :  { %v188_v23 = vadd.f32 %v181_v21, %v109_v20  ;;  %v309_v24 = vpop.f32.mrb[1].mxu1 }
 0x1ba   :  { %v184_v25 = vpop.f32.mrb[2].mxu1 }
 0x1bb   :  { %190 = vst.msk [vmem:[#allocation2] sm:$0xff] %vm32_vm1, %v188_v23  ;;  %v189_v26 = vadd.f32 %v184_v25, %v110_v22  ;;  %v310_v27 = vpop.f32.mrb[3].mxu1 }
 0x1bd   :  { %191 = vst.msk [vmem:[#allocation2 + $0x8] sm:$0xff] %vm32_vm1, %v189_v26 }
 0x1c2   :  { %v195_v29 = vld [vmem:[#allocation2] sm:$0xff] }
 0x1c3   :  { %v204_v30 = vadd.f32 %v280_v28, %v195_v29 }
 0x1c4   :  { %v196_v31 = vld [vmem:[#allocation2 + $0x8] sm:$0xff] }
 0x1c5   :  { %v206_v32 = vadd.f32 %v204_v30, %v35_v3  ;;  %v205_v33 = vadd.f32 %v280_v28, %v196_v31 }
 0x1c7   :  { %v210_v34 = vsel %vm32_vm1, %v206_v32, 0.0  ;;  %v207_v35 = vadd.f32 %v205_v33, %v36_v4 }
 0x1c8   :  { %211 = vadd.xlane.f32.xlu0 %v210_v34 }
 0x1c9   :  { %v213_v36 = vsel %vm32_vm1, %v207_v35, 0.0 }
 0x1cc   :  { %214 = vadd.xlane.f32.xlu0 %v213_v36 }
 0x255   :  { %v212_v37 = vpop.xlane.xlu0 %211 }
 0x256   :  { %v217_v38 = vmul.f32 0.03125, %v212_v37 }
 0x258   :  { %v219_v39 = vsub.f32 %v206_v32, %v217_v38 }
 0x259   :  { %v215_v40 = vpop.xlane.xlu0 %214 }
 0x25a   :  { %v218_v41 = vmul.f32 0.03125, %v215_v40  ;;  %v221_v42 = vmul.f32 %v219_v39, %v219_v39 }
 0x25c   :  { %v220_v43 = vsub.f32 %v207_v35, %v218_v41  ;;  %v223_v44 = vsel %vm32_vm1, %v221_v42, 0.0 }
 0x25d   :  { %224 = vadd.xlane.f32.xlu1 %v223_v44 }
 0x25e   :  { %v222_v45 = vmul.f32 %v220_v43, %v220_v43 }
 0x260   :  { %v226_v46 = vsel %vm32_vm1, %v222_v45, 0.0 }
 0x261   :  { %227 = vadd.xlane.f32.xlu1 %v226_v46 }
 0x2ea   :  { %v225_v47 = vpop.xlane.xlu1 %224 }
 0x2eb   :  { %v229_v48 = vmul.f32 0.03125, %v225_v47 }
 0x2ed   :  { %v231_v49 = vadd.f32 1e-06, %v229_v48 }
 0x2ee   :  { %v228_v50 = vpop.xlane.xlu1 %227 }
 0x2ef   :  { %322 = vrsqrt.f32 %v231_v49  ;;  %v230_v51 = vmul.f32 0.03125, %v228_v50 }
 0x2f1   :  { %v232_v52 = vadd.f32 1e-06, %v230_v51 }
 0x2f3   :  { %324 = vrsqrt.f32 %v232_v52 }
 0x2f9   :  { %v323_v53 = vpop.eup %322 }
 0x2fa   :  { %v235_v55 = vmul.f32 %v323_v53, %v219_v39 }
 0x2fc   :  { %v243_v57 = vmul.f32 %v281_v54, %v235_v55 }
 0x2fd   :  { %v325_v58 = vpop.eup %324 }
 0x2fe   :  { %v236_v59 = vmul.f32 %v325_v58, %v220_v43  ;;  %v251_v60 = vadd.f32 %v282_v56, %v243_v57 }
 0x300   :  { %v244_v61 = vmul.f32 %v281_v54, %v236_v59  ;;  %253 = vst.msk [vmem:[#allocation3] sm:$0xff] %vm32_vm1, %v251_v60 }
 0x302   :  { %v252_v62 = vadd.f32 %v282_v56, %v244_v61 }
 0x304   :  { %254 = vst.msk [vmem:[#allocation3 + $0x8] sm:$0xff] %vm32_vm1, %v252_v62 }
 0x305   :  { %337 = shalt.err (!%p334_p4)
}
 0x306   :  { %s338_s23 = scalar_lea.hbm %s461_s7, 256 }
 0x307   :  { %p339_p5 = scmp.ne.s32.totalorder %s461_s7, %s338_s23  ;;  %p342_p6 = scmp.lt.u32.totalorder %s338_s23, %s461_s7 }
 0x309   :  { %p344_p7 = pnand %p342_p6, %p339_p5 }
 0x30b   :  { %347 = shalt.err (!%p344_p7)
}
 0x30c   :  { %s353_s28 = smov 128   ;;  %s354_s29 = smov 8  }
 0x30d   :  { %266 = dma.vmem_to_hbm [thread:$0]  %s261_s21, 256, %s461_s7, [#allocation4], %s353_s28, %s353_s28, %s354_s29  }
 0x30e   :  { %348 = dma.done.wait [#allocation4], 256  }
 0x30f   :  { %349 = vsyncadd [#allocation4], 4294967040 }
 0x310   :  { %270 = vsyncpa [#allocation4], 1 }

</bundles_post_ra>
